<compile_context>
chip_gen: v5e
topology: v5e:2x2
jax: 0.10.0
libtpu: 0.0.40
codegen_flags: <defaults>
</compile_context>

<pallas_src>
import jax
import jax.numpy as jnp
from jax import lax
from jax.experimental import pallas as pl
from jax.experimental.pallas import tpu as pltpu

GROUPS = 4
C_TOTAL = 512
C_GROUP = C_TOTAL // GROUPS   # 128
TAPS = 9                      # 3x3 kernel taps
EPS = 1e-5


# ---------------------------------------------------------------------------
# Fused kernel: grouped 3x3 conv + BN(batch stats) + ReLU + K-split 1x1 conv.
#   cols_ref:  (M, 9*128)  bf16   im2col slab for this group
#   w1_ref:    (9*128, 128) bf16  grouped 3x3 weights, (kh,kw,ci)-major
#   gamma_ref: (1, 128) f32
#   beta_ref:  (1, 128) f32
#   w2_ref:    (128, 512) bf16    1x1 weight rows for this group's channels
#   o_ref:     (M, 512) f32       resident accumulator across the group axis
# ---------------------------------------------------------------------------
def fused_kernel(cols_ref, w1_ref, gamma_ref, beta_ref, w2_ref, o_ref):
    g = pl.program_id(0)

    # (1) 3x3 grouped conv as one MXU matmul.
    conv = jnp.dot(cols_ref[...], w1_ref[...],
                   preferred_element_type=jnp.float32)           # (M, 128) f32

    # (2) training-mode BatchNorm statistics (biased variance) per channel.
    mean = jnp.mean(conv, axis=0, keepdims=True)                 # (1, 128)
    var = jnp.mean(jnp.square(conv - mean), axis=0, keepdims=True)
    inv = gamma_ref[...] * lax.rsqrt(var + EPS)

    # (3) BN + ReLU in f32.
    y = jnp.maximum((conv - mean) * inv + beta_ref[...], 0.0)

    # (4) K-split 1x1 conv, accumulate into resident output block.
    part = jnp.dot(y.astype(jnp.bfloat16), w2_ref[...],
                   preferred_element_type=jnp.float32)           # (M, 512)

    @pl.when(g == 0)
    def _():
        o_ref[...] = jnp.zeros_like(o_ref)

    o_ref[...] += part


def model_forward(x_nchw, w1, gamma, beta, w2):
    """Forward pass matching PyTorch module M (training-mode BatchNorm)."""
    N, C, H, W = x_nchw.shape
    assert C == C_TOTAL
    G, Cg = GROUPS, C_GROUP
    M = N * H * W
    assert M % 8 == 0, "flattened row count must be sublane-aligned"

    # NCHW -> NHWC, zero-pad spatially for the 3x3 conv (padding=1).
    x = jnp.transpose(x_nchw, (0, 2, 3, 1)).astype(jnp.float32)
    x_pad = jnp.pad(x, ((0, 0), (1, 1), (1, 1), (0, 0)))

    # im2col in the wrapper (input is tiny): cols[g, (n,h,w), (kh,kw,ci)].
    taps = [x_pad[:, kh:kh + H, kw:kw + W, :]
            for kh in range(3) for kw in range(3)]
    patches = jnp.stack(taps, axis=3)                    # (N, H, W, 9, C)
    patches = patches.reshape(N, H, W, TAPS, G, Cg)
    cols = jnp.transpose(patches, (4, 0, 1, 2, 3, 5)).reshape(G, M, TAPS * Cg)
    cols = cols.astype(jnp.bfloat16)

    # PyTorch grouped weight (512, 128, 3, 3) OIHW
    #   -> (G, co_local, ci, kh, kw) -> (G, kh, kw, ci, co_local)
    #   -> (G, 9*Cg, Cg), matching the cols K ordering.
    w1g = jnp.transpose(w1.reshape(G, Cg, Cg, 3, 3), (0, 3, 4, 2, 1))
    w1g = w1g.reshape(G, TAPS * Cg, Cg).astype(jnp.bfloat16)

    # PyTorch 1x1 weight (512, 512, 1, 1) -> (ci, co), K-split per group.
    w2g = jnp.transpose(w2.reshape(C, C), (1, 0)).reshape(G, Cg, C)
    w2g = w2g.astype(jnp.bfloat16)

    gamma_g = gamma.astype(jnp.float32).reshape(G, 1, Cg)
    beta_g = beta.astype(jnp.float32).reshape(G, 1, Cg)

    out_flat = pl.pallas_call(
        fused_kernel,
        out_shape=jax.ShapeDtypeStruct((M, C), jnp.float32),
        grid=(G,),
        in_specs=[
            pl.BlockSpec((None, M, TAPS * Cg), lambda g: (g, 0, 0)),
            pl.BlockSpec((None, TAPS * Cg, Cg), lambda g: (g, 0, 0)),
            pl.BlockSpec((None, 1, Cg), lambda g: (g, 0, 0)),
            pl.BlockSpec((None, 1, Cg), lambda g: (g, 0, 0)),
            pl.BlockSpec((None, Cg, C), lambda g: (g, 0, 0)),
        ],
        out_specs=pl.BlockSpec((M, C), lambda g: (0, 0)),
        compiler_params=pltpu.CompilerParams(
            dimension_semantics=("arbitrary",)),
    )(cols, w1g, gamma_g, beta_g, w2g)

    # (N*H*W, C) -> NHWC -> NCHW
    out = out_flat.reshape(N, H, W, C)
    return jnp.transpose(out, (0, 3, 1, 2))


def reference_forward(x, w1, gamma, beta, w2):
    """Plain-JAX f32 reference (NCHW), mirrors PyTorch training-mode forward."""
    y = lax.conv_general_dilated(
        x, w1, window_strides=(1, 1), padding=((1, 1), (1, 1)),
        dimension_numbers=("NCHW", "OIHW", "NCHW"),
        feature_group_count=GROUPS)
    mean = jnp.mean(y, axis=(0, 2, 3), keepdims=True)
    var = jnp.mean(jnp.square(y - mean), axis=(0, 2, 3), keepdims=True)
    y = (y - mean) / jnp.sqrt(var + EPS)
    y = y * gamma.reshape(1, -1, 1, 1) + beta.reshape(1, -1, 1, 1)
    y = jnp.maximum(y, 0.0)
    out = lax.conv_general_dilated(
        y, w2, window_strides=(1, 1), padding="VALID",
        dimension_numbers=("NCHW", "OIHW", "NCHW"))
    return out


if __name__ == "__main__":
    key = jax.random.PRNGKey(0)
    kx, kw1, kg, kb, kw2 = jax.random.split(key, 5)

    # Channels are fixed at 512 by the module; batch/spatial kept small.
    N, C, H, W = 2, C_TOTAL, 8, 8
    x = jax.random.normal(kx, (N, C, H, W), jnp.float32)

    w1 = 0.05 * jax.random.normal(kw1, (C_TOTAL, C_GROUP, 3, 3), jnp.float32)
    gamma = 1.0 + 0.1 * jax.random.normal(kg, (C_TOTAL,), jnp.float32)
    beta = 0.1 * jax.random.normal(kb, (C_TOTAL,), jnp.float32)
    w2 = 0.05 * jax.random.normal(kw2, (C_TOTAL, C_TOTAL, 1, 1), jnp.float32)

    out = jax.block_until_ready(jax.jit(model_forward)(x, w1, gamma, beta, w2))

    ref = reference_forward(x, w1, gamma, beta, w2)
    assert out.shape == (N, C, H, W), out.shape
    max_err = float(jnp.max(jnp.abs(out - ref)))
    assert jnp.allclose(out, ref, atol=5e-2, rtol=5e-2), max_err

    print("KERNEL_OK")
</pallas_src>

<mosaic_0001>
module attributes {stable_mosaic.version = 11 : i64} {
  func.func @fused_kernel(%arg0: i32, %arg1: memref<1x128x1152xbf16, #tpu.memory_space<vmem>>, %arg2: memref<1x1152x128xbf16, #tpu.memory_space<vmem>>, %arg3: memref<1x1x128xf32, #tpu.memory_space<vmem>>, %arg4: memref<1x1x128xf32, #tpu.memory_space<vmem>>, %arg5: memref<1x128x512xbf16, #tpu.memory_space<vmem>>, %arg6: memref<128x512xf32, #tpu.memory_space<vmem>>) attributes {dimension_semantics = [#tpu.dimension_semantics<arbitrary>], iteration_bounds = array<i64: 4>, scalar_prefetch = 0 : i64, scratch_operands = 0 : i64, tpu.core_type = #tpu.core_type<tc>, window_params = [{transform_indices = @transform_0, window_bounds = array<i64: 1, 128, 1152>}, {transform_indices = @transform_1, window_bounds = array<i64: 1, 1152, 128>}, {transform_indices = @transform_2, window_bounds = array<i64: 1, 1, 128>}, {transform_indices = @transform_3, window_bounds = array<i64: 1, 1, 128>}, {transform_indices = @transform_4, window_bounds = array<i64: 1, 128, 512>}, {pipeline_mode = #tpu.pipeline_mode<synchronous>, transform_indices = @transform_5, window_bounds = array<i64: 128, 512>}]} {
    %c0 = arith.constant 0 : index
    %c0_0 = arith.constant 0 : index
    %c0_1 = arith.constant 0 : index
    %0 = vector.load %arg1[%c0, %c0_0, %c0_1] : memref<1x128x1152xbf16, #tpu.memory_space<vmem>>, vector<1x128x1152xbf16>
    %1 = vector.shape_cast %0 : vector<1x128x1152xbf16> to vector<128x1152xbf16>
    %c0_2 = arith.constant 0 : index
    %c0_3 = arith.constant 0 : index
    %c0_4 = arith.constant 0 : index
    %2 = vector.load %arg2[%c0_2, %c0_3, %c0_4] : memref<1x1152x128xbf16, #tpu.memory_space<vmem>>, vector<1x1152x128xbf16>
    %3 = vector.shape_cast %2 : vector<1x1152x128xbf16> to vector<1152x128xbf16>
    %cst = arith.constant dense<0.000000e+00> : vector<128x128xf32>
    %4 = tpu.matmul %1, %3, %cst {dimension_numbers = #tpu.dot_dimension_numbers<[1], [0], [0], [1], [0, 0, 1, 1], [], []>} : vector<128x1152xbf16>, vector<1152x128xbf16>, vector<128x128xf32> -> vector<128x128xf32>
    %cst_5 = arith.constant dense<0.000000e+00> : vector<128xf32>
    %5 = vector.multi_reduction <add>, %4, %cst_5 [0] : vector<128x128xf32> to vector<128xf32>
    %6 = vector.shape_cast %5 : vector<128xf32> to vector<1x128xf32>
    %cst_6 = arith.constant 1.280000e+02 : f32
    %7 = vector.broadcast %cst_6 : f32 to vector<1x128xf32>
    %8 = arith.divf %6, %7 : vector<1x128xf32>
    %9 = vector.broadcast %8 : vector<1x128xf32> to vector<128x128xf32>
    %10 = arith.subf %4, %9 : vector<128x128xf32>
    %11 = arith.mulf %10, %10 : vector<128x128xf32>
    %cst_7 = arith.constant dense<0.000000e+00> : vector<128xf32>
    %12 = vector.multi_reduction <add>, %11, %cst_7 [0] : vector<128x128xf32> to vector<128xf32>
    %13 = vector.shape_cast %12 : vector<128xf32> to vector<1x128xf32>
    %cst_8 = arith.constant 1.280000e+02 : f32
    %14 = vector.broadcast %cst_8 : f32 to vector<1x128xf32>
    %15 = arith.divf %13, %14 : vector<1x128xf32>
    %c0_9 = arith.constant 0 : index
    %c0_10 = arith.constant 0 : index
    %c0_11 = arith.constant 0 : index
    %16 = vector.load %arg3[%c0_9, %c0_10, %c0_11] : memref<1x1x128xf32, #tpu.memory_space<vmem>>, vector<1x1x128xf32>
    %17 = vector.shape_cast %16 : vector<1x1x128xf32> to vector<1x128xf32>
    %cst_12 = arith.constant 9.99999974E-6 : f32
    %18 = vector.broadcast %cst_12 : f32 to vector<1x128xf32>
    %19 = arith.addf %15, %18 : vector<1x128xf32>
    %20 = math.rsqrt %19 : vector<1x128xf32>
    %21 = arith.mulf %17, %20 : vector<1x128xf32>
    %22 = vector.broadcast %8 : vector<1x128xf32> to vector<128x128xf32>
    %23 = arith.subf %4, %22 : vector<128x128xf32>
    %24 = vector.broadcast %21 : vector<1x128xf32> to vector<128x128xf32>
    %25 = arith.mulf %23, %24 : vector<128x128xf32>
    %c0_13 = arith.constant 0 : index
    %c0_14 = arith.constant 0 : index
    %c0_15 = arith.constant 0 : index
    %26 = vector.load %arg4[%c0_13, %c0_14, %c0_15] : memref<1x1x128xf32, #tpu.memory_space<vmem>>, vector<1x1x128xf32>
    %27 = vector.shape_cast %26 : vector<1x1x128xf32> to vector<1x128xf32>
    %28 = vector.broadcast %27 : vector<1x128xf32> to vector<128x128xf32>
    %29 = arith.addf %25, %28 : vector<128x128xf32>
    %cst_16 = arith.constant 0.000000e+00 : f32
    %30 = vector.broadcast %cst_16 : f32 to vector<128x128xf32>
    %31 = arith.maximumf %29, %30 : vector<128x128xf32>
    %32 = arith.truncf %31 : vector<128x128xf32> to vector<128x128xbf16>
    %c0_17 = arith.constant 0 : index
    %c0_18 = arith.constant 0 : index
    %c0_19 = arith.constant 0 : index
    %33 = vector.load %arg5[%c0_17, %c0_18, %c0_19] : memref<1x128x512xbf16, #tpu.memory_space<vmem>>, vector<1x128x512xbf16>
    %34 = vector.shape_cast %33 : vector<1x128x512xbf16> to vector<128x512xbf16>
    %cst_20 = arith.constant dense<0.000000e+00> : vector<128x512xf32>
    %35 = tpu.matmul %32, %34, %cst_20 {dimension_numbers = #tpu.dot_dimension_numbers<[1], [0], [0], [1], [0, 0, 1, 1], [], []>} : vector<128x128xbf16>, vector<128x512xbf16>, vector<128x512xf32> -> vector<128x512xf32>
    %c0_i32 = arith.constant 0 : i32
    %36 = arith.cmpi eq, %arg0, %c0_i32 : i32
    %37 = arith.extui %36 : i1 to i32
    %c0_i32_21 = arith.constant 0 : i32
    %38 = arith.cmpi ne, %37, %c0_i32_21 : i32
    scf.if %38 {
      %cst_26 = arith.constant 0.000000e+00 : f32
      %42 = vector.broadcast %cst_26 : f32 to vector<128x512xf32>
      %c0_27 = arith.constant 0 : index
      %c0_28 = arith.constant 0 : index
      %43 = vector.load %arg6[%c0_27, %c0_28] : memref<128x512xf32, #tpu.memory_space<vmem>>, vector<128x512xf32>
      tpu.vector_store %arg6[%c0_27, %c0_28], %42 {strides = array<i32>} : memref<128x512xf32, #tpu.memory_space<vmem>>, vector<128x512xf32>,
    } else {
    }
    %c0_22 = arith.constant 0 : index
    %c0_23 = arith.constant 0 : index
    %39 = vector.load %arg6[%c0_22, %c0_23] : memref<128x512xf32, #tpu.memory_space<vmem>>, vector<128x512xf32>
    %40 = arith.addf %39, %35 : vector<128x512xf32>
    %c0_24 = arith.constant 0 : index
    %c0_25 = arith.constant 0 : index
    %41 = vector.load %arg6[%c0_24, %c0_25] : memref<128x512xf32, #tpu.memory_space<vmem>>, vector<128x512xf32>
    tpu.vector_store %arg6[%c0_24, %c0_25], %40 {strides = array<i32>} : memref<128x512xf32, #tpu.memory_space<vmem>>, vector<128x512xf32>,
    return
  }
  func.func @transform_0(%arg0: i32) -> (i32, i32, i32) {
    %c0_i32 = arith.constant 0 : i32
    %c0_i32_0 = arith.constant 0 : i32
    %c0_i32_1 = arith.constant 0 : i32
    return %arg0, %c0_i32, %c0_i32_0 : i32, i32, i32
  }
  func.func @transform_1(%arg0: i32) -> (i32, i32, i32) {
    %c0_i32 = arith.constant 0 : i32
    %c0_i32_0 = arith.constant 0 : i32
    %c0_i32_1 = arith.constant 0 : i32
    return %arg0, %c0_i32, %c0_i32_0 : i32, i32, i32
  }
  func.func @transform_2(%arg0: i32) -> (i32, i32, i32) {
    %c0_i32 = arith.constant 0 : i32
    %c0_i32_0 = arith.constant 0 : i32
    %c0_i32_1 = arith.constant 0 : i32
    return %arg0, %c0_i32, %c0_i32_0 : i32, i32, i32
  }
  func.func @transform_3(%arg0: i32) -> (i32, i32, i32) {
    %c0_i32 = arith.constant 0 : i32
    %c0_i32_0 = arith.constant 0 : i32
    %c0_i32_1 = arith.constant 0 : i32
    return %arg0, %c0_i32, %c0_i32_0 : i32, i32, i32
  }
  func.func @transform_4(%arg0: i32) -> (i32, i32, i32) {
    %c0_i32 = arith.constant 0 : i32
    %c0_i32_0 = arith.constant 0 : i32
    %c0_i32_1 = arith.constant 0 : i32
    return %arg0, %c0_i32, %c0_i32_0 : i32, i32, i32
  }
  func.func @transform_5(%arg0: i32) -> (i32, i32) {
    %c0_i32 = arith.constant 0 : i32
    %c0_i32_0 = arith.constant 0 : i32
    %c0_i32_1 = arith.constant 0 : i32
    return %c0_i32, %c0_i32_0 : i32, i32
  }
}

</mosaic_0001>

<bundles_post_ra>
// kernel: model_forward.1
= control target key start
LH: loop header
LB: loop body
LE: loop exit
PB: predicated region body
PF: predicated region fallthrough
CT: control target
= control target key end

     0   :  { %10 = vsyncpa [#allocation3], 0  ;;  %s3661_s18 = smov 0   ;;  %s4549_s0 = inlined_call_operand.vmem [shape: bf16[4,128,1152], index: 0, kind: input, shape index: {}]   ;;  %s4550_s1 = inlined_call_operand.vmem [shape: bf16[4,1152,128], index: 1, kind: input, shape index: {}]   ;;  %s4551_s2 = inlined_call_operand.vmem [shape: f32[4,1,128], index: 2, kind: input, shape index: {}]   ;;  %s4552_s3 = inlined_call_operand.vmem [shape: f32[4,1,128], index: 3, kind: input, shape index: {}]   ;;  %s4553_s4 = inlined_call_operand.vmem [shape: bf16[4,128,512], index: 4, kind: input, shape index: {}]   ;;  %s4554_s5 = inlined_call_operand.hbm [shape: f32[128,512], index: 5, kind: output, shape index: {}]  }
   0x1 LB: > { %s3667_s19 = sadd.s32 4294967295, %s3624_s18   ;;  %p2646_p0 = scmp.ge.s32.totalorder %s3624_s18, 1  ;;  %s3624_s18 = sphi %s3661_s18, %s16_s18  }
   0x2   : > { %p219_p1 = scmp.lt.s32.totalorder %s3624_s18, 5 }
   0x4   : > { %p220_p2 = pnand %p2646_p0, %p219_p1 }
   0x6   : > { %223 = sbr.rel (%p220_p2) target bundleno = 954 (0x3ba), region = 40 }
   0xb   : > { %p258_p3 = scmp.lt.s32.totalorder %s3667_s19, 3  ;;  %p3355_p4 = scmp.ne.s32.totalorder %s3667_s19, 0 }
   0xd   : > { %s3673_s20 = scalar_select %p258_p3, %s3667_s19, 3 }
   0xf   : > { %s3561_s21 = smul.u32 576, %s3673_s20  ;;  %s273_s30 = scalar_lea.vmem %s4552_s3, %s3673_s20 }
  0x10   : > { %s3360_s6 = sshll.u32 %s3673_s20, 8  ;;  %s270_s12 = scalar_lea.vmem %s4551_s2, %s3673_s20 }
  0x11   : > { %s3681_s24 = scalar_lea.vmem %s4550_s1, %s3561_s21  ;;  %s3695_s27 = scalar_lea.vmem %s4549_s0, %s3561_s21 }
  0x12   : > { %v3440_v0 = vld [vmem:[%s3681_s24 + $0x38] sm:$0xff]  ;;  %v3439_v1 = vld [vmem:[%s3681_s24 + $0x30] sm:$0xff]  ;;  %v3438_v2 = vld [vmem:[%s3681_s24 + $0x28] sm:$0xff]  ;;  %s4033_s9 = scalar_lea.vmem %s4553_s4, %s3360_s6 }
  0x13   : > { %3537 = vmatpush.bf16.msra.mxu1 %v3440_v0  ;;  %3538 = vmatpush.bf16.msra.mxu2 %v3440_v0  ;;  %v3437_v3 = vld [vmem:[%s3681_s24 + $0x20] sm:$0xff]  ;;  %v3436_v4 = vld [vmem:[%s3681_s24 + $0x18] sm:$0xff]  ;;  %v3435_v5 = vld [vmem:[%s3681_s24 + $0x10] sm:$0xff] }
  0x14   : > { %3539 = vmatpush.bf16.msra.mxu3 %v3440_v0  ;;  %1303 = vmatpush.bf16.msra.mxu0 %v3440_v0  ;;  %v3434_v6 = vld [vmem:[%s3681_s24 + $0x8] sm:$0xff]  ;;  %v3433_v7 = vld [vmem:[%s3681_s24] sm:$0xff]  ;;  %v2725_v8 = vld [vmem:[%s3695_s27 + $0x90] sm:$0xf] }
  0x15   : > { %v3383_v9 = vld [vmem:[%s3695_s27 + $0xb0] sm:$0xf0]  ;;  %v2797_v10 = vld [vmem:[%s3695_s27 + $0x120] sm:$0xf]  ;;  %v3401_v11 = vld [vmem:[%s3695_s27 + $0x140] sm:$0xf0] }
  0x16   : > { %v2869_v12 = vld [vmem:[%s3695_s27 + $0x1b0] sm:$0xf]  ;;  %v3419_v13 = vld [vmem:[%s3695_s27 + $0x1d0] sm:$0xf0]  ;;  %v2653_v14 = vld [vmem:[%s3695_s27] sm:$0xf]  ;;  %v2726_v18 = vor.u32 %v3383_v9, %v2725_v8  ;;  %v2798_v19 = vor.u32 %v3401_v11, %v2797_v10 }
  0x17   : > { %3540 = vmatpush.bf16.msra.mxu1 %v3439_v1  ;;  %3541 = vmatpush.bf16.msra.mxu2 %v3439_v1  ;;  %v3365_v15 = vld [vmem:[%s3695_s27 + $0x20] sm:$0xf0]  ;;  %v3456_v16 = vld [vmem:[%s3681_s24 + $0xb8] sm:$0xff]  ;;  %v2870_v20 = vor.u32 %v3419_v13, %v2869_v12  ;;  %v3455_v24 = vld [vmem:[%s3681_s24 + $0xb0] sm:$0xff] }
  0x18   : > { %3542 = vmatpush.bf16.msra.mxu3 %v3439_v1  ;;  %1304 = vmatpush.bf16.msra.mxu0 %v3439_v1  ;;  %v3448_v17 = vld [vmem:[%s3681_s24 + $0x78] sm:$0xff]  ;;  %v2654_v21 = vor.u32 %v3365_v15, %v2653_v14  ;;  %v3447_v25 = vld [vmem:[%s3681_s24 + $0x70] sm:$0xff]  ;;  %v3454_v28 = vld [vmem:[%s3681_s24 + $0xa8] sm:$0xff] }
  0x19   : > { %v3464_v22 = vld [vmem:[%s3681_s24 + $0xf8] sm:$0xff]  ;;  %v3463_v26 = vld [vmem:[%s3681_s24 + $0xf0] sm:$0xff]  ;;  %v3446_v29 = vld [vmem:[%s3681_s24 + $0x68] sm:$0xff] }
  0x1a   : > { %v3472_v23 = vld [vmem:[%s3681_s24 + $0x138] sm:$0xff]  ;;  %v3471_v27 = vld [vmem:[%s3681_s24 + $0x130] sm:$0xff]  ;;  %v3462_v30 = vld [vmem:[%s3681_s24 + $0xe8] sm:$0xff] }
  0x1b   : > { %3543 = vmatpush.bf16.msra.mxu1 %v3438_v2  ;;  %3544 = vmatpush.bf16.msra.mxu2 %v3438_v2  ;;  %v3470_v31 = vld [vmem:[%s3681_s24 + $0x128] sm:$0xff]  ;;  %v3453_v32 = vld [vmem:[%s3681_s24 + $0xa0] sm:$0xff]  ;;  %v2761_v36 = vld [vmem:[%s3695_s27 + $0xd8] sm:$0xf] }
  0x1c   : > { %3545 = vmatpush.bf16.msra.mxu3 %v3438_v2  ;;  %1305 = vmatpush.bf16.msra.mxu0 %v3438_v2  ;;  %v3445_v33 = vld [vmem:[%s3681_s24 + $0x60] sm:$0xff]  ;;  %v3392_v37 = vld [vmem:[%s3695_s27 + $0xf8] sm:$0xf0]  ;;  %v2833_v38 = vld [vmem:[%s3695_s27 + $0x168] sm:$0xf] }
  0x1d   : > { %v3461_v34 = vld [vmem:[%s3681_s24 + $0xe0] sm:$0xff]  ;;  %v3410_v39 = vld [vmem:[%s3695_s27 + $0x188] sm:$0xf0]  ;;  %v2905_v40 = vld [vmem:[%s3695_s27 + $0x1f8] sm:$0xf]  ;;  %v2762_v46 = vor.u32 %v3392_v37, %v2761_v36 }
  0x1e   : > { %v3469_v35 = vld [vmem:[%s3681_s24 + $0x120] sm:$0xff]  ;;  %v3428_v41 = vld [vmem:[%s3695_s27 + $0x218] sm:$0xf0]  ;;  %v2689_v42 = vld [vmem:[%s3695_s27 + $0x48] sm:$0xf]  ;;  %v2834_v47 = vor.u32 %v3410_v39, %v2833_v38 }
  0x1f   : > { %3546 = vmatpush.bf16.msra.mxu1 %v3437_v3  ;;  %3547 = vmatpush.bf16.msra.mxu2 %v3437_v3  ;;  %v3374_v43 = vld [vmem:[%s3695_s27 + $0x68] sm:$0xf0]  ;;  %v3452_v44 = vld [vmem:[%s3681_s24 + $0x98] sm:$0xff]  ;;  %v2906_v48 = vor.u32 %v3428_v41, %v2905_v40  ;;  %v3451_v52 = vld [vmem:[%s3681_s24 + $0x90] sm:$0xff] }
  0x20   : > { %3548 = vmatpush.bf16.msra.mxu3 %v3437_v3  ;;  %1306 = vmatpush.bf16.msra.mxu0 %v3437_v3  ;;  %v3444_v45 = vld [vmem:[%s3681_s24 + $0x58] sm:$0xff]  ;;  %v2690_v49 = vor.u32 %v3374_v43, %v2689_v42  ;;  %v3443_v53 = vld [vmem:[%s3681_s24 + $0x50] sm:$0xff]  ;;  %v3450_v56 = vld [vmem:[%s3681_s24 + $0x88] sm:$0xff] }
  0x21   : > { %v3460_v50 = vld [vmem:[%s3681_s24 + $0xd8] sm:$0xff]  ;;  %v3459_v54 = vld [vmem:[%s3681_s24 + $0xd0] sm:$0xff]  ;;  %v3442_v57 = vld [vmem:[%s3681_s24 + $0x48] sm:$0xff] }
  0x22   : > { %v3468_v51 = vld [vmem:[%s3681_s24 + $0x118] sm:$0xff]  ;;  %v3467_v55 = vld [vmem:[%s3681_s24 + $0x110] sm:$0xff]  ;;  %v3458_v58 = vld [vmem:[%s3681_s24 + $0xc8] sm:$0xff] }
  0x23   : > { %3549 = vmatpush.bf16.msra.mxu1 %v3436_v4  ;;  %3550 = vmatpush.bf16.msra.mxu2 %v3436_v4  ;;  %v3466_v59 = vld [vmem:[%s3681_s24 + $0x108] sm:$0xff]  ;;  %v3449_v60 = vld [vmem:[%s3681_s24 + $0x80] sm:$0xff]  ;;  %v3488_v2 = vld [vmem:[%s3681_s24 + $0x1b8] sm:$0xff] }
  0x24   : > { %3551 = vmatpush.bf16.msra.mxu3 %v3436_v4  ;;  %1307 = vmatpush.bf16.msra.mxu0 %v3436_v4  ;;  %v3441_v61 = vld [vmem:[%s3681_s24 + $0x40] sm:$0xff]  ;;  %v2655_v1 = vld [vmem:[%s3695_s27 + $0x24] sm:$0xf0]  ;;  %v3480_v3 = vld [vmem:[%s3681_s24 + $0x178] sm:$0xff] }
  0x25   : > { %v3361_v62 = vld [vmem:[%s3695_s27 + $0x4] sm:$0xf]  ;;  %v2661_v4 = vld [vmem:[%s3695_s27 + $0x8] sm:$0xf]  ;;  %v2669_v8 = vld [vmem:[%s3695_s27 + $0x10] sm:$0xf] }
  0x26   : > { %v3457_v63 = vld [vmem:[%s3681_s24 + $0xc0] sm:$0xff]  ;;  %v3367_v9 = vld [vmem:[%s3695_s27 + $0x30] sm:$0xf0]  ;;  %v3496_v10 = vld [vmem:[%s3681_s24 + $0x1f8] sm:$0xff]  ;;  %v2658_v12 = vor.u32 %v3361_v62, %v2655_v1 }
  0x27   : > { %3552 = vmatpush.bf16.msra.mxu1 %v3435_v5  ;;  %3553 = vmatpush.bf16.msra.mxu2 %v3435_v5  ;;  %v3465_v0 = vld [vmem:[%s3681_s24 + $0x100] sm:$0xff]  ;;  %v3504_v11 = vld [vmem:[%s3681_s24 + $0x238] sm:$0xff]  ;;  %v2670_v15 = vor.u32 %v3367_v9, %v2669_v8  ;;  %v3379_v40 = vld [vmem:[%s3695_s27 + $0x94] sm:$0xf] }
  0x28   : > { %3554 = vmatpush.bf16.msra.mxu3 %v3435_v5  ;;  %1308 = vmatpush.bf16.msra.mxu0 %v3435_v5  ;;  %v3366_v5 = vld [vmem:[%s3695_s27 + $0x28] sm:$0xf0]  ;;  %v3485_v36 = vld [vmem:[%s3681_s24 + $0x1a0] sm:$0xff]  ;;  %v2727_v41 = vld [vmem:[%s3695_s27 + $0xb4] sm:$0xf0] }
  0x29   : > { %v2662_v13 = vor.u32 %v3366_v5, %v2661_v4  ;;  %v3493_v37 = vld [vmem:[%s3681_s24 + $0x1e0] sm:$0xff]  ;;  %v2733_v42 = vld [vmem:[%s3695_s27 + $0x98] sm:$0xf]  ;;  %v3384_v43 = vld [vmem:[%s3695_s27 + $0xb8] sm:$0xf0] }
  0x2a   : > { %v3477_v38 = vld [vmem:[%s3681_s24 + $0x160] sm:$0xff]  ;;  %v2777_v62 = vld [vmem:[%s3695_s27 + $0xe8] sm:$0xf]  ;;  %v3483_v4 = vld [vmem:[%s3681_s24 + $0x190] sm:$0xff] }
  0x2b   : > { %3555 = vmatpush.bf16.msra.mxu1 %v3434_v6  ;;  %3556 = vmatpush.bf16.msra.mxu2 %v3434_v6  ;;  %v3501_v39 = vld [vmem:[%s3681_s24 + $0x220] sm:$0xff]  ;;  %v3491_v5 = vld [vmem:[%s3681_s24 + $0x1d0] sm:$0xff]  ;;  %v2799_v9 = vld [vmem:[%s3695_s27 + $0x144] sm:$0xf0] }
  0x2c   : > { %3557 = vmatpush.bf16.msra.mxu3 %v3434_v6  ;;  %1309 = vmatpush.bf16.msra.mxu0 %v3434_v6  ;;  %v3362_v6 = vld [vmem:[%s3695_s27 + $0xc] sm:$0xf]  ;;  %v3397_v8 = vld [vmem:[%s3695_s27 + $0x124] sm:$0xf] }
  0x2f   : > { %3558 = vmatpush.bf16.msra.mxu1 %v3433_v7  ;;  %3559 = vmatpush.bf16.msra.mxu2 %v3433_v7 }
  0x30   : > { %3560 = vmatpush.bf16.msra.mxu3 %v3433_v7  ;;  %1310 = vmatpush.bf16.msra.mxu0 %v3433_v7  ;;  %v2663_v7 = vld [vmem:[%s3695_s27 + $0x2c] sm:$0xf0] }
  0x31   : > { %v2666_v14 = vor.u32 %v3362_v6, %v2663_v7  ;;  %v3475_v6 = vld [vmem:[%s3681_s24 + $0x150] sm:$0xff] }
  0x32   : > { %1321 = vmatmul.bf16.vlgmr.msra.gmra.mxu1 %v2726_v18  ;;  %1331 = vmatmul.bf16.vlgmr.msra.gmra.mxu2 %v2798_v19  ;;  %v3495_v18 = vld [vmem:[%s3681_s24 + $0x1f0] sm:$0xff] }
  0x33   : > { %1401 = vmatpush.bf16.msrb.mxu2 %v3456_v16  ;;  %1352 = vmatpush.bf16.msrb.mxu1 %v3448_v17  ;;  %v3487_v16 = vld [vmem:[%s3681_s24 + $0x1b0] sm:$0xff] }
  0x34   : > { %1341 = vmatmul.bf16.vlgmr.msra.gmra.mxu3 %v2870_v20  ;;  %1311 = vmatmul.bf16.vlgmr.msra.gmra.mxu0 %v2654_v21  ;;  %v3479_v17 = vld [vmem:[%s3681_s24 + $0x170] sm:$0xff]  ;;  %v3486_v20 = vld [vmem:[%s3681_s24 + $0x1a8] sm:$0xff] }
  0x35   : > { %1450 = vmatpush.bf16.msrb.mxu3 %v3464_v22  ;;  %1499 = vmatpush.bf16.msrb.mxu0 %v3472_v23  ;;  %v3503_v19 = vld [vmem:[%s3681_s24 + $0x230] sm:$0xff]  ;;  %v3478_v21 = vld [vmem:[%s3681_s24 + $0x168] sm:$0xff] }
  0x36   : > { %v3494_v22 = vld [vmem:[%s3681_s24 + $0x1e8] sm:$0xff]  ;;  %v3499_v7 = vld [vmem:[%s3681_s24 + $0x210] sm:$0xff] }
  0x37   : > { %1402 = vmatpush.bf16.msrb.mxu2 %v3455_v24  ;;  %1353 = vmatpush.bf16.msrb.mxu1 %v3447_v25  ;;  %v3502_v23 = vld [vmem:[%s3681_s24 + $0x228] sm:$0xff]  ;;  %v2691_v25 = vld [vmem:[%s3695_s27 + $0x6c] sm:$0xf0] }
  0x38   : > { %v3370_v24 = vld [vmem:[%s3695_s27 + $0x4c] sm:$0xf] }
  0x39   : > { %1451 = vmatpush.bf16.msrb.mxu3 %v3463_v26  ;;  %1500 = vmatpush.bf16.msrb.mxu0 %v3471_v27  ;;  %v2697_v26 = vld [vmem:[%s3695_s27 + $0x50] sm:$0xf]  ;;  %v3375_v27 = vld [vmem:[%s3695_s27 + $0x70] sm:$0xf0] }
  0x3b   : > { %1403 = vmatpush.bf16.msrb.mxu2 %v3454_v28  ;;  %1354 = vmatpush.bf16.msrb.mxu1 %v3446_v29  ;;  %v3371_v28 = vld [vmem:[%s3695_s27 + $0x54] sm:$0xf]  ;;  %v2699_v29 = vld [vmem:[%s3695_s27 + $0x74] sm:$0xf0] }
  0x3d   : > { %1452 = vmatpush.bf16.msrb.mxu3 %v3462_v30  ;;  %1501 = vmatpush.bf16.msrb.mxu0 %v3470_v31  ;;  %v2705_v30 = vld [vmem:[%s3695_s27 + $0x58] sm:$0xf]  ;;  %v3376_v31 = vld [vmem:[%s3695_s27 + $0x78] sm:$0xf0] }
  0x3f   : > { %1404 = vmatpush.bf16.msrb.mxu2 %v3453_v32  ;;  %1355 = vmatpush.bf16.msrb.mxu1 %v3445_v33  ;;  %v2694_v32 = vor.u32 %v3370_v24, %v2691_v25  ;;  %v2698_v33 = vor.u32 %v3375_v27, %v2697_v26  ;;  %v3406_v24 = vld [vmem:[%s3695_s27 + $0x16c] sm:$0xf]  ;;  %v2835_v25 = vld [vmem:[%s3695_s27 + $0x18c] sm:$0xf0]  ;;  %v3411_v27 = vld [vmem:[%s3695_s27 + $0x190] sm:$0xf0] }
  0x40   : > { %v2841_v26 = vld [vmem:[%s3695_s27 + $0x170] sm:$0xf] }
  0x41   : > { %1453 = vmatpush.bf16.msrb.mxu3 %v3461_v34  ;;  %1502 = vmatpush.bf16.msrb.mxu0 %v3469_v35  ;;  %v2702_v34 = vor.u32 %v3371_v28, %v2699_v29  ;;  %v2706_v35 = vor.u32 %v3376_v31, %v2705_v30  ;;  %v3407_v28 = vld [vmem:[%s3695_s27 + $0x174] sm:$0xf]  ;;  %v2843_v29 = vld [vmem:[%s3695_s27 + $0x194] sm:$0xf0]  ;;  %v3412_v31 = vld [vmem:[%s3695_s27 + $0x198] sm:$0xf0] }
  0x42   : > { %1326 = vmatmul.bf16.gmra.mxu1 %v2762_v46  ;;  %1336 = vmatmul.bf16.gmra.mxu2 %v2834_v47  ;;  %v2741_v46 = vld [vmem:[%s3695_s27 + $0xa0] sm:$0xf]  ;;  %v3385_v47 = vld [vmem:[%s3695_s27 + $0xc0] sm:$0xf0]  ;;  %v2849_v30 = vld [vmem:[%s3695_s27 + $0x178] sm:$0xf] }
  0x43   : > { %1405 = vmatpush.bf16.msrb.mxu2 %v3452_v44  ;;  %1356 = vmatpush.bf16.msrb.mxu1 %v3444_v45  ;;  %v3380_v44 = vld [vmem:[%s3695_s27 + $0x9c] sm:$0xf]  ;;  %v2735_v45 = vld [vmem:[%s3695_s27 + $0xbc] sm:$0xf0] }
  0x44   : > { %1346 = vmatmul.bf16.gmra.mxu3 %v2906_v48  ;;  %1316 = vmatmul.bf16.gmra.mxu0 %v2690_v49  ;;  %v2730_v48 = vor.u32 %v3379_v40, %v2727_v41  ;;  %v2734_v49 = vor.u32 %v3384_v43, %v2733_v42  ;;  %v3415_v40 = vld [vmem:[%s3695_s27 + $0x1b4] sm:$0xf]  ;;  %v2871_v41 = vld [vmem:[%s3695_s27 + $0x1d4] sm:$0xf0]  ;;  %v3420_v43 = vld [vmem:[%s3695_s27 + $0x1d8] sm:$0xf0] }
  0x45   : > { %1454 = vmatpush.bf16.msrb.mxu3 %v3460_v50  ;;  %1503 = vmatpush.bf16.msrb.mxu0 %v3468_v51  ;;  %v2738_v50 = vor.u32 %v3380_v44, %v2735_v45  ;;  %v2742_v51 = vor.u32 %v3385_v47, %v2741_v46  ;;  %v2877_v42 = vld [vmem:[%s3695_s27 + $0x1b8] sm:$0xf]  ;;  %v3416_v44 = vld [vmem:[%s3695_s27 + $0x1bc] sm:$0xf]  ;;  %v2879_v45 = vld [vmem:[%s3695_s27 + $0x1dc] sm:$0xf0] }
  0x46   : > { %v2885_v46 = vld [vmem:[%s3695_s27 + $0x1c0] sm:$0xf]  ;;  %v3421_v47 = vld [vmem:[%s3695_s27 + $0x1e0] sm:$0xf0] }
  0x47   : > { %1406 = vmatpush.bf16.msrb.mxu2 %v3451_v52  ;;  %1357 = vmatpush.bf16.msrb.mxu1 %v3443_v53  ;;  %v3484_v52 = vld [vmem:[%s3681_s24 + $0x198] sm:$0xff] }
  0x48   : > { %v3492_v53 = vld [vmem:[%s3681_s24 + $0x1d8] sm:$0xff] }
  0x49   : > { %1455 = vmatpush.bf16.msrb.mxu3 %v3459_v54  ;;  %1504 = vmatpush.bf16.msrb.mxu0 %v3467_v55  ;;  %v3476_v54 = vld [vmem:[%s3681_s24 + $0x158] sm:$0xff] }
  0x4a   : > { %v3500_v55 = vld [vmem:[%s3681_s24 + $0x218] sm:$0xff] }
  0x4b   : > { %1407 = vmatpush.bf16.msrb.mxu2 %v3450_v56  ;;  %1358 = vmatpush.bf16.msrb.mxu1 %v3442_v57  ;;  %v3388_v56 = vld [vmem:[%s3695_s27 + $0xdc] sm:$0xf]  ;;  %v2763_v57 = vld [vmem:[%s3695_s27 + $0xfc] sm:$0xf0] }
  0x4d   : > { %1456 = vmatpush.bf16.msrb.mxu3 %v3458_v58  ;;  %1505 = vmatpush.bf16.msrb.mxu0 %v3466_v59  ;;  %v2769_v58 = vld [vmem:[%s3695_s27 + $0xe0] sm:$0xf]  ;;  %v3393_v59 = vld [vmem:[%s3695_s27 + $0x100] sm:$0xf0] }
  0x4e   : > { %v2770_v1 = vor.u32 %v3393_v59, %v2769_v58  ;;  %v3424_v58 = vld [vmem:[%s3695_s27 + $0x1fc] sm:$0xf]  ;;  %v2907_v59 = vld [vmem:[%s3695_s27 + $0x21c] sm:$0xf0] }
  0x4f   : > { %1408 = vmatpush.bf16.msrb.mxu2 %v3449_v60  ;;  %1359 = vmatpush.bf16.msrb.mxu1 %v3441_v61  ;;  %v3389_v60 = vld [vmem:[%s3695_s27 + $0xe4] sm:$0xf]  ;;  %v2771_v61 = vld [vmem:[%s3695_s27 + $0x104] sm:$0xf0] }
  0x51   : > { %1457 = vmatpush.bf16.msrb.mxu3 %v3457_v63  ;;  %1506 = vmatpush.bf16.msrb.mxu0 %v3465_v0  ;;  %v3394_v63 = vld [vmem:[%s3695_s27 + $0x108] sm:$0xf0]  ;;  %v2766_v0 = vor.u32 %v3388_v56, %v2763_v57 }
  0x52   : > { %1360 = vmatmul.bf16.vlgmr.msrb.gmra.mxu1 %v2658_v12  ;;  %1409 = vmatmul.bf16.vlgmr.msrb.gmra.mxu2 %v2662_v13  ;;  %v3398_v12 = vld [vmem:[%s3695_s27 + $0x12c] sm:$0xf]  ;;  %v2807_v13 = vld [vmem:[%s3695_s27 + $0x14c] sm:$0xf0] }
  0x53   : > { %1597 = vmatpush.bf16.msra.mxu2 %v3488_v2  ;;  %1548 = vmatpush.bf16.msra.mxu1 %v3480_v3  ;;  %v2774_v2 = vor.u32 %v3389_v60, %v2771_v61  ;;  %v2778_v3 = vor.u32 %v3394_v63, %v2777_v62  ;;  %v2913_v60 = vld [vmem:[%s3695_s27 + $0x200] sm:$0xf]  ;;  %v3429_v61 = vld [vmem:[%s3695_s27 + $0x220] sm:$0xf0]  ;;  %v2915_v63 = vld [vmem:[%s3695_s27 + $0x224] sm:$0xf0] }
  0x54   : > { %1458 = vmatmul.bf16.vlgmr.msrb.gmra.mxu3 %v2666_v14  ;;  %1507 = vmatmul.bf16.vlgmr.msrb.gmra.mxu0 %v2670_v15  ;;  %v2813_v14 = vld [vmem:[%s3695_s27 + $0x130] sm:$0xf]  ;;  %v3403_v15 = vld [vmem:[%s3695_s27 + $0x150] sm:$0xf0]  ;;  %v3425_v62 = vld [vmem:[%s3695_s27 + $0x204] sm:$0xf] }
  0x55   : > { %1646 = vmatpush.bf16.msra.mxu3 %v3496_v10  ;;  %1695 = vmatpush.bf16.msra.mxu0 %v3504_v11  ;;  %v2805_v10 = vld [vmem:[%s3695_s27 + $0x128] sm:$0xf]  ;;  %v3402_v11 = vld [vmem:[%s3695_s27 + $0x148] sm:$0xf0] }
  0x57   : > { %1598 = vmatpush.bf16.msra.mxu2 %v3487_v16  ;;  %1549 = vmatpush.bf16.msra.mxu1 %v3479_v17  ;;  %v2802_v16 = vor.u32 %v3397_v8, %v2799_v9  ;;  %v2806_v17 = vor.u32 %v3402_v11, %v2805_v10 }
  0x59   : > { %1647 = vmatpush.bf16.msra.mxu3 %v3495_v18  ;;  %1696 = vmatpush.bf16.msra.mxu0 %v3503_v19  ;;  %v2810_v18 = vor.u32 %v3398_v12, %v2807_v13  ;;  %v2814_v19 = vor.u32 %v3403_v15, %v2813_v14  ;;  %v3363_v14 = vld [vmem:[%s3695_s27 + $0x14] sm:$0xf]  ;;  %v2671_v15 = vld [vmem:[%s3695_s27 + $0x34] sm:$0xf0] }
  0x5b   : > { %1599 = vmatpush.bf16.msra.mxu2 %v3486_v20  ;;  %1550 = vmatpush.bf16.msra.mxu1 %v3478_v21  ;;  %v3482_v20 = vld [vmem:[%s3681_s24 + $0x188] sm:$0xff] }
  0x5c   : > { %v3490_v21 = vld [vmem:[%s3681_s24 + $0x1c8] sm:$0xff] }
  0x5d   : > { %1648 = vmatpush.bf16.msra.mxu3 %v3494_v22  ;;  %1697 = vmatpush.bf16.msra.mxu0 %v3502_v23  ;;  %v3474_v22 = vld [vmem:[%s3681_s24 + $0x148] sm:$0xff] }
  0x5e   : > { %v3498_v23 = vld [vmem:[%s3681_s24 + $0x208] sm:$0xff] }
  0x5f   : > { %1600 = vmatpush.bf16.msra.mxu2 %v3485_v36  ;;  %1551 = vmatpush.bf16.msra.mxu1 %v3477_v38  ;;  %v3481_v36 = vld [vmem:[%s3681_s24 + $0x180] sm:$0xff] }
  0x60   : > { %v3473_v38 = vld [vmem:[%s3681_s24 + $0x140] sm:$0xff] }
  0x61   : > { %1649 = vmatpush.bf16.msra.mxu3 %v3493_v37  ;;  %1698 = vmatpush.bf16.msra.mxu0 %v3501_v39  ;;  %v3489_v37 = vld [vmem:[%s3681_s24 + $0x1c0] sm:$0xff] }
  0x62   : > { %1365 = vmatmul.bf16.gmra.mxu1 %v2694_v32  ;;  %1414 = vmatmul.bf16.gmra.mxu2 %v2698_v33  ;;  %v2838_v32 = vor.u32 %v3406_v24, %v2835_v25  ;;  %v2842_v33 = vor.u32 %v3411_v27, %v2841_v26  ;;  %v3497_v39 = vld [vmem:[%s3681_s24 + $0x200] sm:$0xff]  ;;  %v2674_v24 = vor.u32 %v3363_v14, %v2671_v15  ;;  %v2743_v14 = vld [vmem:[%s3695_s27 + $0xc4] sm:$0xf0] }
  0x63   : > { %1601 = vmatpush.bf16.msra.mxu2 %v3484_v52  ;;  %1552 = vmatpush.bf16.msra.mxu1 %v3476_v54  ;;  %v2886_v52 = vor.u32 %v3421_v47, %v2885_v46  ;;  %v3378_v46 = vld [vmem:[%s3695_s27 + $0x88] sm:$0xf0] }
  0x64   : > { %1463 = vmatmul.bf16.gmra.mxu3 %v2702_v34  ;;  %1512 = vmatmul.bf16.gmra.mxu0 %v2706_v35  ;;  %v2846_v34 = vor.u32 %v3407_v28, %v2843_v29  ;;  %v2850_v35 = vor.u32 %v3412_v31, %v2849_v30 }
  0x65   : > { %1650 = vmatpush.bf16.msra.mxu3 %v3492_v53  ;;  %1699 = vmatpush.bf16.msra.mxu0 %v3500_v55 }
  0x67   : > { %1602 = vmatpush.bf16.msra.mxu2 %v3483_v4  ;;  %1553 = vmatpush.bf16.msra.mxu1 %v3475_v6  ;;  %v2910_v4 = vor.u32 %v3424_v58, %v2907_v59 }
  0x69   : > { %1651 = vmatpush.bf16.msra.mxu3 %v3491_v5  ;;  %1700 = vmatpush.bf16.msra.mxu0 %v3499_v7  ;;  %v2914_v5 = vor.u32 %v3429_v61, %v2913_v60  ;;  %v2918_v7 = vor.u32 %v3425_v62, %v2915_v63 }
  0x6b   : > { %1603 = vmatpush.bf16.msra.mxu2 %v3482_v20  ;;  %1554 = vmatpush.bf16.msra.mxu1 %v3474_v22  ;;  %v2685_v20 = vld [vmem:[%s3695_s27 + $0x20] sm:$0xf] }
  0x6d   : > { %1652 = vmatpush.bf16.msra.mxu3 %v3490_v21  ;;  %1701 = vmatpush.bf16.msra.mxu0 %v3498_v23  ;;  %v3369_v21 = vld [vmem:[%s3695_s27 + $0x40] sm:$0xf0] }
  0x6e   : > { %v2686_v28 = vor.u32 %v3369_v21, %v2685_v20  ;;  %v2757_v20 = vld [vmem:[%s3695_s27 + $0xb0] sm:$0xf]  ;;  %v3387_v21 = vld [vmem:[%s3695_s27 + $0xd0] sm:$0xf0] }
  0x6f   : > { %1604 = vmatpush.bf16.msra.mxu2 %v3481_v36  ;;  %1555 = vmatpush.bf16.msra.mxu1 %v3473_v38  ;;  %v3372_v38 = vld [vmem:[%s3695_s27 + $0x5c] sm:$0xf] }
  0x71   : > { %1653 = vmatpush.bf16.msra.mxu3 %v3489_v37  ;;  %1702 = vmatpush.bf16.msra.mxu0 %v3497_v39  ;;  %v2707_v39 = vld [vmem:[%s3695_s27 + $0x7c] sm:$0xf0] }
  0x72   : > { %1370 = vmatmul.bf16.gmra.mxu1 %v2730_v48  ;;  %1419 = vmatmul.bf16.gmra.mxu2 %v2734_v49  ;;  %v2874_v48 = vor.u32 %v3415_v40, %v2871_v41  ;;  %v2878_v49 = vor.u32 %v3420_v43, %v2877_v42  ;;  %v2713_v41 = vld [vmem:[%s3695_s27 + $0x60] sm:$0xf]  ;;  %v3377_v42 = vld [vmem:[%s3695_s27 + $0x80] sm:$0xf0] }
  0x73   : > { %v3373_v43 = vld [vmem:[%s3695_s27 + $0x64] sm:$0xf] }
  0x74   : > { %1468 = vmatmul.bf16.gmra.mxu3 %v2738_v50  ;;  %1517 = vmatmul.bf16.gmra.mxu0 %v2742_v51  ;;  %v2882_v51 = vor.u32 %v3416_v44, %v2879_v45  ;;  %v2715_v44 = vld [vmem:[%s3695_s27 + $0x84] sm:$0xf0] }
  0x75   : > { %v2721_v45 = vld [vmem:[%s3695_s27 + $0x68] sm:$0xf]  ;;  %v2718_v58 = vor.u32 %v3373_v43, %v2715_v44  ;;  %v2779_v43 = vld [vmem:[%s3695_s27 + $0x10c] sm:$0xf0] }
  0x76   : > { %v2722_v59 = vor.u32 %v3378_v46, %v2721_v45  ;;  %v2785_v45 = vld [vmem:[%s3695_s27 + $0xf0] sm:$0xf]  ;;  %v3395_v46 = vld [vmem:[%s3695_s27 + $0x110] sm:$0xf0] }
  0x82   : > { %1375 = vmatmul.bf16.gmra.mxu1 %v2766_v0  ;;  %1424 = vmatmul.bf16.gmra.mxu2 %v2770_v1  ;;  %v2921_v0 = vld [vmem:[%s3695_s27 + $0x208] sm:$0xf]  ;;  %v3430_v1 = vld [vmem:[%s3695_s27 + $0x228] sm:$0xf0] }
  0x83   : > { %v2922_v8 = vor.u32 %v3430_v1, %v2921_v0 }
  0x84   : > { %1473 = vmatmul.bf16.gmra.mxu3 %v2774_v2  ;;  %1522 = vmatmul.bf16.gmra.mxu0 %v2778_v3 }
  0x92   : > { %1380 = vmatmul.bf16.gmra.mxu1 %v2802_v16  ;;  %1429 = vmatmul.bf16.gmra.mxu2 %v2806_v17  ;;  %v2677_v16 = vld [vmem:[%s3695_s27 + $0x18] sm:$0xf]  ;;  %v3368_v17 = vld [vmem:[%s3695_s27 + $0x38] sm:$0xf0] }
  0x93   : > { %v2678_v25 = vor.u32 %v3368_v17, %v2677_v16  ;;  %v2749_v16 = vld [vmem:[%s3695_s27 + $0xa8] sm:$0xf]  ;;  %v3386_v17 = vld [vmem:[%s3695_s27 + $0xc8] sm:$0xf0] }
  0x94   : > { %1478 = vmatmul.bf16.gmra.mxu3 %v2810_v18  ;;  %1527 = vmatmul.bf16.gmra.mxu0 %v2814_v19  ;;  %v3364_v18 = vld [vmem:[%s3695_s27 + $0x1c] sm:$0xf]  ;;  %v2679_v19 = vld [vmem:[%s3695_s27 + $0x3c] sm:$0xf0] }
  0x95   : > { %v2682_v27 = vor.u32 %v3364_v18, %v2679_v19  ;;  %v3382_v18 = vld [vmem:[%s3695_s27 + $0xac] sm:$0xf]  ;;  %v2751_v19 = vld [vmem:[%s3695_s27 + $0xcc] sm:$0xf0] }
  0xa2   : > { %1385 = vmatmul.bf16.gmra.mxu1 %v2838_v32  ;;  %1434 = vmatmul.bf16.gmra.mxu2 %v2842_v33 }
  0xa4   : > { %1483 = vmatmul.bf16.gmra.mxu3 %v2846_v34  ;;  %1532 = vmatmul.bf16.gmra.mxu0 %v2850_v35 }
  0xaf   : > { %v3834_v50 = vpop.f32.mrf.mxu1 }
  0xb1   : > { %v1312_v53 = vpop.f32.mrf.mxu0 }
  0xb2   : > { %1390 = vmatmul.bf16.gmra.mxu1 %v2874_v48  ;;  %1439 = vmatmul.bf16.gmra.mxu2 %v2878_v49 }
  0xb4   : > { %1488 = vmatmul.bf16.gmra.mxu3 %v2882_v51  ;;  %1537 = vmatmul.bf16.gmra.mxu0 %v2886_v52  ;;  %v2710_v51 = vor.u32 %v3372_v38, %v2707_v39  ;;  %v2714_v52 = vor.u32 %v3377_v42, %v2713_v41  ;;  %v3390_v42 = vld [vmem:[%s3695_s27 + $0xec] sm:$0xf] }
  0xb5   : > { %v3836_v54 = vpop.f32.mrf.mxu2 }
  0xb7   : > { %v3838_v55 = vpop.f32.mrf.mxu3  ;;  %v3840_v56 = vpop.f32.mrf.mxu1 }
  0xb9   : > { %v1314_v57 = vpop.f32.mrf.mxu0 }
  0xbd   : > { %v3850_v2 = vpop.f32.mrf.mxu2 }
  0xbf   : > { %v3852_v3 = vpop.f32.mrf.mxu3  ;;  %v3854_v6 = vpop.f32.mrf.mxu1 }
  0xc1   : > { %v1317_v9 = vpop.f32.mrf.mxu0 }
  0xc2   : > { %1395 = vmatmul.bf16.gmra.mxu1 %v2910_v4  ;;  %1444 = vmatmul.bf16.gmra.mxu2 %v2914_v5 }
  0xc4   : > { %1493 = vmatmul.bf16.gmra.mxu3 %v2918_v7  ;;  %1542 = vmatmul.bf16.gmra.mxu0 %v2922_v8 }
  0xc5   : > { %v3856_v10 = vpop.f32.mrf.mxu2 }
  0xc7   : > { %v3858_v11 = vpop.f32.mrf.mxu3  ;;  %v3860_v12 = vpop.f32.mrf.mxu1 }
  0xc9   : > { %v1319_v13 = vpop.f32.mrf.mxu0 }
  0xcd   : > { %v3870_v22 = vpop.f32.mrf.mxu2 }
  0xcf   : > { %v3872_v23 = vpop.f32.mrf.mxu3  ;;  %v1361_v26 = vpop.f32.mrf.mxu1 }
  0xd0   : > { %v1362_v29 = vadd.f32 %v1361_v26, %v1312_v53 }
  0xd1   : > { %v1508_v30 = vpop.f32.mrf.mxu0 }
  0xd2   : > { %1556 = vmatmul.bf16.vlgmr.msra.gmra.mxu1 %v2674_v24  ;;  %1605 = vmatmul.bf16.vlgmr.msra.gmra.mxu2 %v2678_v25 }
  0xd4   : > { %1654 = vmatmul.bf16.vlgmr.msra.gmra.mxu3 %v2682_v27  ;;  %1703 = vmatmul.bf16.vlgmr.msra.gmra.mxu0 %v2686_v28  ;;  %v2750_v28 = vor.u32 %v3386_v17, %v2749_v16  ;;  %v3399_v17 = vld [vmem:[%s3695_s27 + $0x134] sm:$0xf] }
  0xd5   : > { %v1410_v31 = vpop.f32.mrf.mxu2 }
  0xd6   : > { %v1411_v32 = vadd.f32 %v1410_v31, %v1362_v29  ;;  %v2758_v31 = vor.u32 %v3387_v21, %v2757_v20  ;;  %v2821_v20 = vld [vmem:[%s3695_s27 + $0x138] sm:$0xf]  ;;  %v3404_v21 = vld [vmem:[%s3695_s27 + $0x158] sm:$0xf0] }
  0xd7   : > { %v1459_v33 = vpop.f32.mrf.mxu3  ;;  %v1363_v34 = vpop.f32.mrf.mxu1 }
  0xd8   : > { %v1460_v35 = vadd.f32 %v1459_v33, %v1411_v32  ;;  %v1364_v36 = vadd.f32 %v1363_v34, %v1314_v57 }
  0xd9   : > { %v1510_v37 = vpop.f32.mrf.mxu0 }
  0xda   : > { %v3876_v40 = vadd.f32 %v1508_v30, %v1460_v35  ;;  %v2754_v30 = vor.u32 %v3382_v18, %v2751_v19  ;;  %v2815_v18 = vld [vmem:[%s3695_s27 + $0x154] sm:$0xf0] }
  0xdd   : > { %v1412_v47 = vpop.f32.mrf.mxu2 }
  0xde   : > { %v1413_v48 = vadd.f32 %v1412_v47, %v1364_v36  ;;  %v3391_v47 = vld [vmem:[%s3695_s27 + $0xf4] sm:$0xf] }
  0xdf   : > { %v1461_v49 = vpop.f32.mrf.mxu3  ;;  %v1366_v53 = vpop.f32.mrf.mxu1 }
  0xe0   : > { %v1462_v57 = vadd.f32 %v1461_v49, %v1413_v48  ;;  %v1367_v60 = vadd.f32 %v1366_v53, %v1317_v9  ;;  %v3381_v9 = vld [vmem:[%s3695_s27 + $0xa4] sm:$0xf]  ;;  %v2787_v48 = vld [vmem:[%s3695_s27 + $0x114] sm:$0xf0] }
  0xe1   : > { %v1513_v61 = vpop.f32.mrf.mxu0  ;;  %v2746_v27 = vor.u32 %v3381_v9, %v2743_v14  ;;  %v2793_v49 = vld [vmem:[%s3695_s27 + $0xf8] sm:$0xf] }
  0xe2   : > { %1561 = vmatmul.bf16.gmra.mxu1 %v2710_v51  ;;  %1610 = vmatmul.bf16.gmra.mxu2 %v2714_v52  ;;  %v3884_v62 = vadd.f32 %v1510_v37, %v1462_v57  ;;  %v3396_v51 = vld [vmem:[%s3695_s27 + $0x118] sm:$0xf0]  ;;  %v2786_v57 = vor.u32 %v3395_v46, %v2785_v45 }
  0xe3   : > { %v3408_v46 = vld [vmem:[%s3695_s27 + $0x17c] sm:$0xf] }
  0xe4   : > { %1659 = vmatmul.bf16.gmra.mxu3 %v2718_v58  ;;  %1708 = vmatmul.bf16.gmra.mxu0 %v2722_v59  ;;  %v2782_v59 = vor.u32 %v3390_v42, %v2779_v43 }
  0xe5   : > { %v1415_v63 = vpop.f32.mrf.mxu2 }
  0xe6   : > { %v1416_v0 = vadd.f32 %v1415_v63, %v1367_v60  ;;  %v2794_v63 = vor.u32 %v3396_v51, %v2793_v49  ;;  %v2857_v49 = vld [vmem:[%s3695_s27 + $0x180] sm:$0xf]  ;;  %v3413_v51 = vld [vmem:[%s3695_s27 + $0x1a0] sm:$0xf0] }
  0xe7   : > { %v1464_v1 = vpop.f32.mrf.mxu3  ;;  %v1368_v4 = vpop.f32.mrf.mxu1 }
  0xe8   : > { %v1465_v5 = vadd.f32 %v1464_v1, %v1416_v0  ;;  %v1369_v7 = vadd.f32 %v1368_v4, %v1319_v13 }
  0xe9   : > { %v1515_v8 = vpop.f32.mrf.mxu0 }
  0xea   : > { %v3888_v15 = vadd.f32 %v1513_v61, %v1465_v5  ;;  %v2790_v61 = vor.u32 %v3391_v47, %v2787_v48  ;;  %v2851_v47 = vld [vmem:[%s3695_s27 + $0x19c] sm:$0xf0] }
  0xed   : > { %v1417_v24 = vpop.f32.mrf.mxu2 }
  0xee   : > { %v1418_v25 = vadd.f32 %v1417_v24, %v1369_v7  ;;  %v3400_v24 = vld [vmem:[%s3695_s27 + $0x13c] sm:$0xf] }
  0xef   : > { %v1466_v26 = vpop.f32.mrf.mxu3  ;;  %v1371_v29 = vpop.f32.mrf.mxu1 }
  0xf0   : > { %v1467_v13 = vadd.f32 %v1466_v26, %v1418_v25  ;;  %v1372_v32 = vadd.f32 %v1371_v29, %v3834_v50  ;;  %v2823_v25 = vld [vmem:[%s3695_s27 + $0x15c] sm:$0xf0] }
  0xf1   : > { %v1518_v33 = vpop.f32.mrf.mxu0  ;;  %v2829_v26 = vld [vmem:[%s3695_s27 + $0x140] sm:$0xf] }
  0xf2   : > { %1566 = vmatmul.bf16.gmra.mxu1 %v2746_v27  ;;  %1615 = vmatmul.bf16.gmra.mxu2 %v2750_v28  ;;  %v3897_v34 = vadd.f32 %v1515_v8, %v1467_v13  ;;  %v3405_v27 = vld [vmem:[%s3695_s27 + $0x160] sm:$0xf0]  ;;  %v2822_v13 = vor.u32 %v3404_v21, %v2821_v20  ;;  %v2893_v21 = vld [vmem:[%s3695_s27 + $0x1c8] sm:$0xf] }
  0xf4   : > { %1664 = vmatmul.bf16.gmra.mxu3 %v2754_v30  ;;  %1713 = vmatmul.bf16.gmra.mxu0 %v2758_v31  ;;  %v2818_v31 = vor.u32 %v3399_v17, %v2815_v18  ;;  %v3417_v17 = vld [vmem:[%s3695_s27 + $0x1c4] sm:$0xf]  ;;  %v2887_v18 = vld [vmem:[%s3695_s27 + $0x1e4] sm:$0xf0] }
  0xf5   : > { %v1420_v35 = vpop.f32.mrf.mxu2 }
  0xf6   : > { %v1421_v36 = vadd.f32 %v1420_v35, %v1372_v32 }
  0xf7   : > { %v1469_v37 = vpop.f32.mrf.mxu3  ;;  %v1373_v38 = vpop.f32.mrf.mxu1 }
  0xf8   : > { %v1470_v39 = vadd.f32 %v1469_v37, %v1421_v36  ;;  %v1374_v50 = vadd.f32 %v1373_v38, %v3840_v56 }
  0xf9   : > { %v1520_v41 = vpop.f32.mrf.mxu0 }
  0xfa   : > { %v3902_v44 = vadd.f32 %v1518_v33, %v1470_v39  ;;  %v2826_v33 = vor.u32 %v3400_v24, %v2823_v25  ;;  %v3422_v24 = vld [vmem:[%s3695_s27 + $0x1e8] sm:$0xf0] }
  0xfb   : > { %v3418_v25 = vld [vmem:[%s3695_s27 + $0x1cc] sm:$0xf] }
  0xfd   : > { %v1422_v52 = vpop.f32.mrf.mxu2 }
  0xfe   : > { %v1423_v53 = vadd.f32 %v1422_v52, %v1374_v50  ;;  %v3409_v52 = vld [vmem:[%s3695_s27 + $0x184] sm:$0xf] }
  0xff   : > { %v1471_v58 = vpop.f32.mrf.mxu3  ;;  %v1376_v60 = vpop.f32.mrf.mxu1 }
 0x100   : > { %v1472_v56 = vadd.f32 %v1471_v58, %v1423_v53  ;;  %v1377_v0 = vadd.f32 %v1376_v60, %v3854_v6  ;;  %v2859_v53 = vld [vmem:[%s3695_s27 + $0x1a4] sm:$0xf0]  ;;  %v2854_v60 = vor.u32 %v3408_v46, %v2851_v47  ;;  %v3426_v46 = vld [vmem:[%s3695_s27 + $0x20c] sm:$0xf]  ;;  %v2923_v47 = vld [vmem:[%s3695_s27 + $0x22c] sm:$0xf0] }
 0x101   : > { %v1523_v1 = vpop.f32.mrf.mxu0  ;;  %v2865_v58 = vld [vmem:[%s3695_s27 + $0x188] sm:$0xf] }
 0x102   : > { %1571 = vmatmul.bf16.gmra.mxu1 %v2782_v59  ;;  %1620 = vmatmul.bf16.gmra.mxu2 %v2786_v57  ;;  %v3911_v4 = vadd.f32 %v1520_v41, %v1472_v56  ;;  %v3414_v59 = vld [vmem:[%s3695_s27 + $0x1a8] sm:$0xf0]  ;;  %v2862_v56 = vor.u32 %v3409_v52, %v2859_v53  ;;  %v3431_v52 = vld [vmem:[%s3695_s27 + $0x230] sm:$0xf0] }
 0x103   : > { %v3427_v53 = vld [vmem:[%s3695_s27 + $0x214] sm:$0xf] }
 0x104   : > { %1669 = vmatmul.bf16.gmra.mxu3 %v2790_v61  ;;  %1718 = vmatmul.bf16.gmra.mxu0 %v2794_v63  ;;  %v2858_v61 = vor.u32 %v3413_v51, %v2857_v49  ;;  %v2929_v51 = vld [vmem:[%s3695_s27 + $0x210] sm:$0xf] }
 0x105   : > { %v1425_v5 = vpop.f32.mrf.mxu2 }
 0x106   : > { %v1426_v7 = vadd.f32 %v1425_v5, %v1377_v0  ;;  %v2866_v0 = vor.u32 %v3414_v59, %v2865_v58  ;;  %v2931_v58 = vld [vmem:[%s3695_s27 + $0x234] sm:$0xf0] }
 0x107   : > { %v1474_v8 = vpop.f32.mrf.mxu3  ;;  %v1378_v9 = vpop.f32.mrf.mxu1  ;;  %v2937_v59 = vld [vmem:[%s3695_s27 + $0x218] sm:$0xf] }
 0x108   : > { %v1475_v14 = vadd.f32 %v1474_v8, %v1426_v7  ;;  %v1379_v6 = vadd.f32 %v1378_v9, %v3860_v12  ;;  %v2830_v12 = vor.u32 %v3405_v27, %v2829_v26  ;;  %v2895_v26 = vld [vmem:[%s3695_s27 + $0x1ec] sm:$0xf0] }
 0x109   : > { %v1525_v16 = vpop.f32.mrf.mxu0  ;;  %v2901_v27 = vld [vmem:[%s3695_s27 + $0x1d0] sm:$0xf] }
 0x10a   : > { %v3916_v19 = vadd.f32 %v1523_v1, %v1475_v14 }
 0x10d   : > { %v1427_v28 = vpop.f32.mrf.mxu2 }
 0x10e   : > { %v1428_v29 = vadd.f32 %v1427_v28, %v1379_v6  ;;  %v3423_v28 = vld [vmem:[%s3695_s27 + $0x1f0] sm:$0xf0] }
 0x10f   : > { %v1476_v30 = vpop.f32.mrf.mxu3  ;;  %v1381_v32 = vpop.f32.mrf.mxu1 }
 0x110   : > { %v1477_v35 = vadd.f32 %v1476_v30, %v1428_v29  ;;  %v1382_v38 = vadd.f32 %v1381_v32, %v3836_v54  ;;  %v2890_v30 = vor.u32 %v3417_v17, %v2887_v18  ;;  %v2898_v32 = vor.u32 %v3418_v25, %v2895_v26 }
 0x111   : > { %v1528_v36 = vpop.f32.mrf.mxu0 }
 0x112   : > { %1576 = vmatmul.bf16.gmra.mxu1 %v2818_v31  ;;  %1625 = vmatmul.bf16.gmra.mxu2 %v2822_v13  ;;  %v3924_v37 = vadd.f32 %v1525_v16, %v1477_v35  ;;  %v2894_v31 = vor.u32 %v3422_v24, %v2893_v21 }
 0x114   : > { %1674 = vmatmul.bf16.gmra.mxu3 %v2826_v33  ;;  %1723 = vmatmul.bf16.gmra.mxu0 %v2830_v12  ;;  %v2902_v33 = vor.u32 %v3423_v28, %v2901_v27 }
 0x115   : > { %v1430_v39 = vpop.f32.mrf.mxu2 }
 0x116   : > { %v1431_v50 = vadd.f32 %v1430_v39, %v1382_v38 }
 0x117   : > { %v1479_v41 = vpop.f32.mrf.mxu3  ;;  %v3927_v42 = vpop.f32.mrf.mxu1 }
 0x118   : > { %v1480_v43 = vadd.f32 %v1479_v41, %v1431_v50 }
 0x119   : > { %v3929_v45 = vpop.f32.mrf.mxu0 }
 0x11a   : > { %v3933_v48 = vadd.f32 %v1528_v36, %v1480_v43 }
 0x11d   : > { %v3941_v57 = vpop.f32.mrf.mxu2 }
 0x11f   : > { %v3943_v54 = vpop.f32.mrf.mxu3  ;;  %v1386_v63 = vpop.f32.mrf.mxu1 }
 0x120   : > { %v1387_v5 = vadd.f32 %v1386_v63, %v3856_v10  ;;  %v2926_v63 = vor.u32 %v3426_v46, %v2923_v47 }
 0x121   : > { %v1533_v1 = vpop.f32.mrf.mxu0 }
 0x122   : > { %1581 = vmatmul.bf16.gmra.mxu1 %v2854_v60  ;;  %1630 = vmatmul.bf16.gmra.mxu2 %v2858_v61  ;;  %v3432_v60 = vld [vmem:[%s3695_s27 + $0x238] sm:$0xf0] }
 0x124   : > { %1679 = vmatmul.bf16.gmra.mxu3 %v2862_v56  ;;  %1728 = vmatmul.bf16.gmra.mxu0 %v2866_v0  ;;  %v2930_v56 = vor.u32 %v3431_v52, %v2929_v51 }
 0x125   : > { %v1435_v7 = vpop.f32.mrf.mxu2 }
 0x126   : > { %v1436_v8 = vadd.f32 %v1435_v7, %v1387_v5  ;;  %v2938_v5 = vor.u32 %v3432_v60, %v2937_v59 }
 0x127   : > { %v1484_v9 = vpop.f32.mrf.mxu3  ;;  %v3946_v14 = vpop.f32.mrf.mxu1 }
 0x128   : > { %v1485_v6 = vadd.f32 %v1484_v9, %v1436_v8 }
 0x129   : > { %v3948_v16 = vpop.f32.mrf.mxu0 }
 0x12a   : > { %v3952_v20 = vadd.f32 %v1533_v1, %v1485_v6  ;;  %v2934_v1 = vor.u32 %v3427_v53, %v2931_v58 }
 0x12d   : > { %v3960_v29 = vpop.f32.mrf.mxu2 }
 0x12f   : > { %v3962_v10 = vpop.f32.mrf.mxu3  ;;  %v1391_v13 = vpop.f32.mrf.mxu1 }
 0x130   : > { %v1392_v35 = vadd.f32 %v1391_v13, %v3838_v55 }
 0x131   : > { %v1538_v12 = vpop.f32.mrf.mxu0 }
 0x132   : > { %1586 = vmatmul.bf16.gmra.mxu1 %v2890_v30  ;;  %1635 = vmatmul.bf16.gmra.mxu2 %v2894_v31 }
 0x134   : > { %1684 = vmatmul.bf16.gmra.mxu3 %v2898_v32  ;;  %1733 = vmatmul.bf16.gmra.mxu0 %v2902_v33 }
 0x135   : > { %v1440_v36 = vpop.f32.mrf.mxu2 }
 0x136   : > { %v1441_v38 = vadd.f32 %v1440_v36, %v1392_v35 }
 0x137   : > { %v1489_v39 = vpop.f32.mrf.mxu3  ;;  %v3965_v50 = vpop.f32.mrf.mxu1 }
 0x138   : > { %v1490_v41 = vadd.f32 %v1489_v39, %v1441_v38 }
 0x139   : > { %v3967_v43 = vpop.f32.mrf.mxu0 }
 0x13a   : > { %v3971_v49 = vadd.f32 %v1538_v12, %v1490_v41 }
 0x13d   : > { %v3979_v61 = vpop.f32.mrf.mxu2 }
 0x13f   : > { %v3981_v55 = vpop.f32.mrf.mxu3  ;;  %v1396_v0 = vpop.f32.mrf.mxu1 }
 0x140   : > { %v1397_v8 = vadd.f32 %v1396_v0, %v3858_v11 }
 0x141   : > { %v1543_v7 = vpop.f32.mrf.mxu0 }
 0x142   : > { %1591 = vmatmul.bf16.gmra.mxu1 %v2926_v63  ;;  %1640 = vmatmul.bf16.gmra.mxu2 %v2930_v56 }
 0x144   : > { %1689 = vmatmul.bf16.gmra.mxu3 %v2934_v1  ;;  %1738 = vmatmul.bf16.gmra.mxu0 %v2938_v5 }
 0x145   : > { %v1445_v9 = vpop.f32.mrf.mxu2 }
 0x146   : > { %v1446_v6 = vadd.f32 %v1445_v9, %v1397_v8 }
 0x147   : > { %v1494_v17 = vpop.f32.mrf.mxu3  ;;  %v3984_v18 = vpop.f32.mrf.mxu1 }
 0x148   : > { %v1495_v21 = vadd.f32 %v1494_v17, %v1446_v6 }
 0x149   : > { %v3986_v24 = vpop.f32.mrf.mxu0 }
 0x14a   : > { %v3988_v25 = vadd.f32 %v1543_v7, %v1495_v21 }
 0x14d   : > { %v3990_v26 = vpop.f32.mrf.mxu2 }
 0x14f   : > { %v3992_v27 = vpop.f32.mrf.mxu3  ;;  %v1557_v28 = vpop.f32.mrf.mxu1 }
 0x150   : > { %v1558_v11 = vadd.f32 %v1557_v28, %v3876_v40 }
 0x151   : > { %v1704_v30 = vpop.f32.mrf.mxu0 }
 0x155   : > { %v1606_v31 = vpop.f32.mrf.mxu2 }
 0x156   : > { %v1607_v13 = vadd.f32 %v1606_v31, %v1558_v11 }
 0x157   : > { %v1655_v32 = vpop.f32.mrf.mxu3  ;;  %v1559_v33 = vpop.f32.mrf.mxu1 }
 0x158   : > { %v1656_v12 = vadd.f32 %v1655_v32, %v1607_v13  ;;  %v1560_v38 = vadd.f32 %v1559_v33, %v3884_v62 }
 0x159   : > { %v1706_v35 = vpop.f32.mrf.mxu0 }
 0x15a   : > { %v3999_v36 = vadd.f32 %v1704_v30, %v1656_v12 }
 0x15d   : > { %v1608_v39 = vpop.f32.mrf.mxu2 }
 0x15e   : > { %v1609_v41 = vadd.f32 %v1608_v39, %v1560_v38 }
 0x15f   : > { %v1657_v46 = vpop.f32.mrf.mxu3  ;;  %v1562_v47 = vpop.f32.mrf.mxu1 }
 0x160   : > { %v1658_v51 = vadd.f32 %v1657_v46, %v1609_v41  ;;  %v1563_v52 = vadd.f32 %v1562_v47, %v3888_v15 }
 0x161   : > { %v1709_v53 = vpop.f32.mrf.mxu0 }
 0x162   : > { %v4003_v40 = vadd.f32 %v1706_v35, %v1658_v51 }
 0x164   : > { %v1744_v58 = vadd.f32 %v4003_v40, %v3999_v36 }
 0x165   : > { %v1611_v59 = vpop.f32.mrf.mxu2 }
 0x166   : > { %v1612_v60 = vadd.f32 %v1611_v59, %v1563_v52 }
 0x167   : > { %v1660_v63 = vpop.f32.mrf.mxu3  ;;  %v1564_v56 = vpop.f32.mrf.mxu1 }
 0x168   : > { %v1661_v0 = vadd.f32 %v1660_v63, %v1612_v60  ;;  %v1565_v7 = vadd.f32 %v1564_v56, %v3897_v34 }
 0x169   : > { %v1711_v1 = vpop.f32.mrf.mxu0 }
 0x16a   : > { %v4007_v62 = vadd.f32 %v1709_v53, %v1661_v0 }
 0x16c   : > { %v1745_v5 = vadd.f32 %v1744_v58, %v4007_v62 }
 0x16d   : > { %v1613_v8 = vpop.f32.mrf.mxu2 }
 0x16e   : > { %v1614_v15 = vadd.f32 %v1613_v8, %v1565_v7 }
 0x16f   : > { %v1662_v9 = vpop.f32.mrf.mxu3  ;;  %v1567_v6 = vpop.f32.mrf.mxu1 }
 0x170   : > { %v1663_v17 = vadd.f32 %v1662_v9, %v1614_v15  ;;  %v1568_v21 = vadd.f32 %v1567_v6, %v3902_v44 }
 0x171   : > { %v1714_v28 = vpop.f32.mrf.mxu0 }
 0x172   : > { %v4012_v11 = vadd.f32 %v1711_v1, %v1663_v17 }
 0x174   : > { %v1746_v30 = vadd.f32 %v1745_v5, %v4012_v11 }
 0x175   : > { %v1616_v31 = vpop.f32.mrf.mxu2 }
 0x176   : > { %v1617_v13 = vadd.f32 %v1616_v31, %v1568_v21 }
 0x177   : > { %v1665_v32 = vpop.f32.mrf.mxu3  ;;  %v1569_v33 = vpop.f32.mrf.mxu1 }
 0x178   : > { %v1666_v12 = vadd.f32 %v1665_v32, %v1617_v13  ;;  %v1570_v39 = vadd.f32 %v1569_v33, %v3911_v4  ;;  %v3349_v32 = vld [vmem:[%s4033_s9 + $0xe8] sm:$0xf] }
 0x179   : > { %v1716_v35 = vpop.f32.mrf.mxu0 }
 0x17a   : > { %v4015_v38 = vadd.f32 %v1714_v28, %v1666_v12 }
 0x17c   : > { %v1747_v34 = vadd.f32 %v1746_v30, %v4015_v38 }
 0x17d   : > { %v1618_v41 = vpop.f32.mrf.mxu2 }
 0x17e   : > { %v1619_v46 = vadd.f32 %v1618_v41, %v1570_v39 }
 0x17f   : > { %v1667_v44 = vpop.f32.mrf.mxu3  ;;  %v1572_v47 = vpop.f32.mrf.mxu1 }
 0x180   : > { %v1668_v51 = vadd.f32 %v1667_v44, %v1619_v46  ;;  %v1573_v59 = vadd.f32 %v1572_v47, %v3916_v19  ;;  %v1384_v19 = vadd.f32 %v3927_v42, %v3850_v2  ;;  %v3533_v2 = vld [vmem:[%s4033_s9 + $0xe4] sm:$0xf]  ;;  %v3343_v42 = vld [vmem:[%s4033_s9 + $0xf0] sm:$0xf0] }
 0x181   : > { %v1719_v52 = vpop.f32.mrf.mxu0  ;;  %v3346_v12 = vor.u32 %v3533_v2, %v3343_v42 }
 0x182   : > { %v4019_v53 = vadd.f32 %v1716_v35, %v1668_v51  ;;  %v3536_v35 = vld [vmem:[%s4033_s9 + $0xf4] sm:$0xf0] }
 0x183   : > { %2144 = vmatpush.bf16.msrb.mxu2 %v3346_v12 }
 0x184   : > { %v1748_v58 = vadd.f32 %v1747_v34, %v4019_v53 }
 0x185   : > { %v1621_v60 = vpop.f32.mrf.mxu2 }
 0x186   : > { %v1622_v63 = vadd.f32 %v1621_v60, %v1573_v59  ;;  %v3341_v59 = vld [vmem:[%s4033_s9 + $0xe0] sm:$0xf]  ;;  %v3535_v60 = vld [vmem:[%s4033_s9 + $0xec] sm:$0xf0] }
 0x187   : > { %v1670_v56 = vpop.f32.mrf.mxu3  ;;  %v1574_v0 = vpop.f32.mrf.mxu1 }
 0x188   : > { %v1671_v1 = vadd.f32 %v1670_v56, %v1622_v63  ;;  %v1575_v8 = vadd.f32 %v1574_v0, %v3924_v37  ;;  %v1433_v37 = vadd.f32 %v3941_v57, %v1384_v19  ;;  %v3350_v57 = vor.u32 %v3536_v35, %v3349_v32  ;;  %v3351_v0 = vld [vmem:[%s4033_s9 + $0xf8] sm:$0xf0]  ;;  %v3529_v19 = vld [vmem:[%s4033_s9 + $0xc4] sm:$0xf] }
 0x189   : > { %v1721_v5 = vpop.f32.mrf.mxu0  ;;  %v3342_v56 = vor.u32 %v3535_v60, %v3341_v59 }
 0x18a   : > { %v4023_v4 = vadd.f32 %v1719_v52, %v1671_v1  ;;  %v1482_v34 = vadd.f32 %v3943_v54, %v1433_v37  ;;  %2193 = vmatpush.bf16.msrb.mxu3 %v3350_v57  ;;  %v3534_v54 = vld [vmem:[%s4033_s9 + $0xec] sm:$0xf]  ;;  %v3531_v57 = vld [vmem:[%s4033_s9 + $0xcc] sm:$0xf0] }
 0x18b   : > { %2095 = vmatpush.bf16.msrb.mxu1 %v3342_v56 }
 0x18c   : > { %v1749_v7 = vadd.f32 %v1748_v58, %v4023_v4  ;;  %v1531_v51 = vadd.f32 %v3929_v45, %v1482_v34  ;;  %v1389_v45 = vadd.f32 %v3946_v14, %v3870_v22 }
 0x18d   : > { %v1623_v15 = vpop.f32.mrf.mxu2 }
 0x18e   : > { %v1624_v9 = vadd.f32 %v1623_v15, %v1575_v8 }
 0x18f   : > { %v1672_v6 = vpop.f32.mrf.mxu3  ;;  %v1577_v17 = vpop.f32.mrf.mxu1 }
 0x190   : > { %v1673_v21 = vadd.f32 %v1672_v6, %v1624_v9  ;;  %v1578_v13 = vadd.f32 %v1577_v17, %v3933_v48  ;;  %v1438_v9 = vadd.f32 %v3960_v29, %v1389_v45 }
 0x191   : > { %v1724_v28 = vpop.f32.mrf.mxu0 }
 0x192   : > { %v4036_v30 = vadd.f32 %v1721_v5, %v1673_v21  ;;  %v3327_v21 = vld [vmem:[%s4033_s9 + $0xd0] sm:$0xf0]  ;;  %v1487_v2 = vadd.f32 %v3962_v10, %v1438_v9 }
 0x194   : > { %v1750_v31 = vadd.f32 %v1749_v7, %v4036_v30  ;;  %v3354_v7 = vor.u32 %v3534_v54, %v3351_v0  ;;  %v1536_v34 = vadd.f32 %v3948_v16, %v1487_v2 }
 0x195   : > { %v1626_v33 = vpop.f32.mrf.mxu2 }
 0x196   : > { %v1627_v39 = vadd.f32 %v1626_v33, %v1578_v13  ;;  %2242 = vmatpush.bf16.msrb.mxu0 %v3354_v7  ;;  %v3532_v13 = vld [vmem:[%s4033_s9 + $0xd4] sm:$0xf0] }
 0x197   : > { %v1675_v41 = vpop.f32.mrf.mxu3  ;;  %v1579_v46 = vpop.f32.mrf.mxu1 }
 0x198   : > { %v1676_v44 = vadd.f32 %v1675_v41, %v1627_v39  ;;  %v1580_v58 = vadd.f32 %v1579_v46, %v1531_v51  ;;  %v3325_v41 = vld [vmem:[%s4033_s9 + $0xc0] sm:$0xf]  ;;  %v3530_v46 = vld [vmem:[%s4033_s9 + $0xcc] sm:$0xf]  ;;  %v3335_v51 = vld [vmem:[%s4033_s9 + $0xd8] sm:$0xf0] }
 0x199   : > { %v1726_v47 = vpop.f32.mrf.mxu0  ;;  %v3338_v60 = vor.u32 %v3530_v46, %v3335_v51 }
 0x19a   : > { %v4045_v48 = vadd.f32 %v1724_v28, %v1676_v44  ;;  %v3333_v28 = vld [vmem:[%s4033_s9 + $0xc8] sm:$0xf] }
 0x19b   : > { %v3334_v32 = vor.u32 %v3532_v13, %v3333_v28  ;;  %2243 = vmatpush.bf16.msrb.mxu0 %v3338_v60 }
 0x19c   : > { %v1751_v52 = vadd.f32 %v1750_v31, %v4045_v48  ;;  %v3330_v31 = vor.u32 %v3529_v19, %v3327_v21 }
 0x19d   : > { %v1628_v63 = vpop.f32.mrf.mxu2  ;;  %2194 = vmatpush.bf16.msrb.mxu3 %v3334_v32 }
 0x19e   : > { %v1629_v1 = vadd.f32 %v1628_v63, %v1580_v58  ;;  %2145 = vmatpush.bf16.msrb.mxu2 %v3330_v31 }
 0x19f   : > { %v1677_v5 = vpop.f32.mrf.mxu3  ;;  %v1582_v8 = vpop.f32.mrf.mxu1 }
 0x1a0   : > { %v1678_v6 = vadd.f32 %v1677_v5, %v1629_v1  ;;  %v1583_v17 = vadd.f32 %v1582_v8, %v3952_v20 }
 0x1a1   : > { %v1729_v15 = vpop.f32.mrf.mxu0 }
 0x1a2   : > { %v4062_v42 = vadd.f32 %v1726_v47, %v1678_v6  ;;  %v3326_v47 = vor.u32 %v3531_v57, %v3325_v41 }
 0x1a4   : > { %v1752_v12 = vadd.f32 %v1751_v52, %v4062_v42  ;;  %2096 = vmatpush.bf16.msrb.mxu1 %v3326_v47  ;;  %v1394_v52 = vadd.f32 %v3965_v50, %v3852_v3 }
 0x1a5   : > { %v1631_v37 = vpop.f32.mrf.mxu2 }
 0x1a6   : > { %v1632_v22 = vadd.f32 %v1631_v37, %v1583_v17  ;;  %v1443_v16 = vadd.f32 %v3979_v61, %v1394_v52 }
 0x1a7   : > { %v1680_v14 = vpop.f32.mrf.mxu3  ;;  %v1584_v29 = vpop.f32.mrf.mxu1 }
 0x1a8   : > { %v1681_v20 = vadd.f32 %v1680_v14, %v1632_v22  ;;  %v1585_v39 = vadd.f32 %v1584_v29, %v1536_v34  ;;  %v1492_v5 = vadd.f32 %v3981_v55, %v1443_v16  ;;  %v1399_v55 = vadd.f32 %v3984_v18, %v3872_v23 }
 0x1a9   : > { %v1731_v33 = vpop.f32.mrf.mxu0 }
 0x1aa   : > { %v4065_v35 = vadd.f32 %v1729_v15, %v1681_v20  ;;  %v1541_v3 = vadd.f32 %v3967_v43, %v1492_v5  ;;  %v1448_v31 = vadd.f32 %v3990_v26, %v1399_v55  ;;  %v3626_v20 = vmov 128.0  }
 0x1ab   : > { %3582 = vrcp.f32 %v3626_v20 }
 0x1ac   : > { %v1753_v10 = vadd.f32 %v1752_v12, %v4065_v35  ;;  %v1497_v14 = vadd.f32 %v3992_v27, %v1448_v31 }
 0x1ad   : > { %v1633_v44 = vpop.f32.mrf.mxu2 }
 0x1ae   : > { %v1634_v58 = vadd.f32 %v1633_v44, %v1585_v39  ;;  %v1546_v18 = vadd.f32 %v3986_v24, %v1497_v14 }
 0x1af   : > { %v1682_v59 = vpop.f32.mrf.mxu3  ;;  %v1587_v54 = vpop.f32.mrf.mxu1 }
 0x1b0   : > { %v1683_v63 = vadd.f32 %v1682_v59, %v1634_v58  ;;  %v1588_v0 = vadd.f32 %v1587_v54, %v3971_v49 }
 0x1b1   : > { %v1734_v56 = vpop.f32.mrf.mxu0  ;;  %v3583_v26 = vpop.eup %3582 }
 0x1b2   : > { %v4078_v7 = vadd.f32 %v1731_v33, %v1683_v63  ;;  %v1766_v46 = vmul.f32 128.0, %v3583_v26  ;;  %vm1770_vm0 = vweird.f32 %v3583_v26 }
 0x1b4   : > { %v1754_v6 = vadd.f32 %v1753_v10, %v4078_v7  ;;  %v1767_v58 = vsub.f32 1.0, %v1766_v46  ;;  %v3526_v46 = vld [vmem:[%s4033_s9 + $0xac] sm:$0xf] }
 0x1b5   : > { %v1636_v1 = vpop.f32.mrf.mxu2 }
 0x1b6   : > { %v1637_v8 = vadd.f32 %v1636_v1, %v1588_v0  ;;  %v1768_v54 = vmul.f32 %v3583_v26, %v1767_v58 }
 0x1b7   : > { %v1685_v45 = vpop.f32.mrf.mxu3  ;;  %v1589_v15 = vpop.f32.mrf.mxu1 }
 0x1b8   : > { %v1686_v9 = vadd.f32 %v1685_v45, %v1637_v8  ;;  %v1590_v61 = vadd.f32 %v1589_v15, %v1541_v3  ;;  %v1769_v63 = vadd.f32 %v3583_v26, %v1768_v54  ;;  %v3521_v54 = vld [vmem:[%s4033_s9 + $0x84] sm:$0xf] }
 0x1b9   : > { %v1736_v19 = vpop.f32.mrf.mxu0 }
 0x1ba   : > { %v1735_v17 = vadd.f32 %v1734_v56, %v1686_v9  ;;  %v4094_v0 = vsel %vm1770_vm0, %v3583_v26, %v1769_v63 }
 0x1bc   : > { %v1755_v50 = vadd.f32 %v1754_v6, %v1735_v17 }
 0x1bd   : > { %v1638_v21 = vpop.f32.mrf.mxu2 }
 0x1be   : > { %v1639_v28 = vadd.f32 %v1638_v21, %v1590_v61 }
 0x1bf   : > { %v1687_v49 = vpop.f32.mrf.mxu3  ;;  %v1592_v37 = vpop.f32.mrf.mxu1 }
 0x1c0   : > { %v1688_v13 = vadd.f32 %v1687_v49, %v1639_v28  ;;  %v1593_v2 = vadd.f32 %v1592_v37, %v3988_v25 }
 0x1c1   : > { %v1739_v33 = vpop.f32.mrf.mxu0 }
 0x1c2   : > { %v4087_v32 = vadd.f32 %v1736_v19, %v1688_v13 }
 0x1c4   : > { %v1756_v10 = vadd.f32 %v1755_v50, %v4087_v32 }
 0x1c5   : > { %v1641_v22 = vpop.f32.mrf.mxu2 }
 0x1c6   : > { %v1642_v43 = vadd.f32 %v1641_v22, %v1593_v2 }
 0x1c7   : > { %v1690_v29 = vpop.f32.mrf.mxu3  ;;  %v1594_v34 = vpop.f32.mrf.mxu1 }
 0x1c8   : > { %v1691_v12 = vadd.f32 %v1690_v29, %v1642_v43  ;;  %v1595_v25 = vadd.f32 %v1594_v34, %v1546_v18 }
 0x1c9   : > { %v1741_v47 = vpop.f32.mrf.mxu0 }
 0x1ca   : > { %v1740_v23 = vadd.f32 %v1739_v33, %v1691_v12 }
 0x1cc   : > { %v1757_v39 = vadd.f32 %v1756_v10, %v1740_v23  ;;  %v3311_v10 = vld [vmem:[%s4033_s9 + $0xb0] sm:$0xf0] }
 0x1cd   : > { %v1643_v41 = vpop.f32.mrf.mxu2 }
 0x1ce   : > { %v1644_v57 = vadd.f32 %v1643_v41, %v1595_v25  ;;  %v3528_v25 = vld [vmem:[%s4033_s9 + $0xb4] sm:$0xf0]  ;;  %v3309_v41 = vld [vmem:[%s4033_s9 + $0xa0] sm:$0xf] }
 0x1cf   : > { %v1692_v27 = vpop.f32.mrf.mxu3 }
 0x1d0   : > { %v1693_v44 = vadd.f32 %v1692_v27, %v1644_v57  ;;  %v3527_v57 = vld [vmem:[%s4033_s9 + $0xac] sm:$0xf0] }
 0x1d1   : > { %v3310_v27 = vor.u32 %v3527_v57, %v3309_v41 }
 0x1d2   : > { %v4091_v51 = vadd.f32 %v1741_v47, %v1693_v44  ;;  %v3319_v44 = vld [vmem:[%s4033_s9 + $0xb8] sm:$0xf0] }
 0x1d3   : > { %2097 = vmatpush.bf16.msrb.mxu1 %v3310_v27  ;;  %v3271_v27 = vld [vmem:[%s4033_s9 + $0x58] sm:$0xf0] }
 0x1d4   : > { %v1758_v59 = vadd.f32 %v1757_v39, %v4091_v51 }
 0x1d6   : > { %v1759_v60 = vrot.slane %v1758_v59, 4 }
 0x1d8   : > { %v1760_v52 = vadd.f32 %v1759_v60, %v1758_v59  ;;  %v3322_v60 = vor.u32 %v3526_v46, %v3319_v44 }
 0x1da   : > { %v1761_v16 = vrot.slane %v1760_v52, 2  ;;  %2244 = vmatpush.bf16.msrb.mxu0 %v3322_v60  ;;  %v3253_v60 = vld [vmem:[%s4033_s9 + $0x28] sm:$0xf] }
 0x1dc   : > { %v1762_v24 = vadd.f32 %v1761_v16, %v1760_v52  ;;  %v3295_v52 = vld [vmem:[%s4033_s9 + $0x90] sm:$0xf0]  ;;  %v3301_v16 = vld [vmem:[%s4033_s9 + $0x88] sm:$0xf] }
 0x1de   : > { %v1763_v56 = vrot.slane %v1762_v24, 1 }
 0x1e0   : > { %v1764_v1 = vadd.f32 %v1763_v56, %v1762_v24  ;;  %v3524_v56 = vld [vmem:[%s4033_s9 + $0x94] sm:$0xf0] }
 0x1e2   : > { %v1772_v5 = vmul.f32 %v4094_v0, %v1764_v1  ;;  %v3293_v1 = vld [vmem:[%s4033_s9 + $0x80] sm:$0xf] }
 0x1e4   : > { %v4098_v8 = vsub.f32 %v3999_v36, %v1772_v5  ;;  %v4101_v45 = vsub.f32 %v4003_v40, %v1772_v5  ;;  %v4104_v15 = vsub.f32 %v4007_v62, %v1772_v5  ;;  %v4107_v9 = vsub.f32 %v4012_v11, %v1772_v5 }
 0x1e5   : > { %v4110_v6 = vsub.f32 %v4015_v38, %v1772_v5  ;;  %v4113_v3 = vsub.f32 %v4019_v53, %v1772_v5  ;;  %v4116_v50 = vsub.f32 %v4023_v4, %v1772_v5  ;;  %v4119_v36 = vsub.f32 %v4036_v30, %v1772_v5 }
 0x1e6   : > { %v4122_v40 = vsub.f32 %v4045_v48, %v1772_v5  ;;  %v4125_v62 = vsub.f32 %v4065_v35, %v1772_v5  ;;  %v4127_v11 = vsub.f32 %v1735_v17, %v1772_v5  ;;  %v4129_v61 = vsub.f32 %v1740_v23, %v1772_v5  ;;  %v3317_v23 = vld [vmem:[%s4033_s9 + $0xa8] sm:$0xf] }
 0x1e7   : > { %v1789_v38 = vmul.f32 %v4098_v8, %v4098_v8  ;;  %v1790_v53 = vmul.f32 %v4101_v45, %v4101_v45  ;;  %v1791_v4 = vmul.f32 %v4104_v15, %v4104_v15  ;;  %v1792_v48 = vmul.f32 %v4107_v9, %v4107_v9 }
 0x1e8   : > { %v1793_v35 = vmul.f32 %v4110_v6, %v4110_v6  ;;  %v1794_v21 = vmul.f32 %v4113_v3, %v4113_v3  ;;  %v1795_v49 = vmul.f32 %v4116_v50, %v4116_v50  ;;  %v4146_v55 = vsub.f32 %v4062_v42, %v1772_v5 }
 0x1e9   : > { %v1805_v30 = vadd.f32 %v1790_v53, %v1789_v38  ;;  %v1796_v31 = vmul.f32 %v4119_v36, %v4119_v36  ;;  %v1797_v2 = vmul.f32 %v4122_v40, %v4122_v40  ;;  %v4153_v14 = vsub.f32 %v4078_v7, %v1772_v5  ;;  %v3525_v7 = vld [vmem:[%s4033_s9 + $0xa4] sm:$0xf] }
 0x1ea   : > { %v1798_v43 = vmul.f32 %v4146_v55, %v4146_v55  ;;  %v1799_v42 = vmul.f32 %v4125_v62, %v4125_v62  ;;  %v4160_v33 = vsub.f32 %v4087_v32, %v1772_v5  ;;  %v1801_v18 = vmul.f32 %v4127_v11, %v4127_v11 }
 0x1eb   : > { %v1806_v19 = vadd.f32 %v1805_v30, %v1791_v4  ;;  %v1800_v12 = vmul.f32 %v4153_v14, %v4153_v14  ;;  %v3314_v39 = vor.u32 %v3525_v7, %v3311_v10  ;;  %v3318_v32 = vor.u32 %v3528_v25, %v3317_v23  ;;  %v3522_v4 = vld [vmem:[%s4033_s9 + $0x8c] sm:$0xf]  ;;  %v3303_v30 = vld [vmem:[%s4033_s9 + $0x98] sm:$0xf0]  ;;  %v3263_v7 = vld [vmem:[%s4033_s9 + $0x50] sm:$0xf0] }
 0x1ec   : > { %v4175_v47 = vsub.f32 %v4091_v51, %v1772_v5  ;;  %v1802_v58 = vmul.f32 %v4160_v33, %v4160_v33  ;;  %v1803_v63 = vmul.f32 %v4129_v61, %v4129_v61  ;;  %v3298_v51 = vor.u32 %v3521_v54, %v3295_v52  ;;  %v3523_v5 = vld [vmem:[%s4033_s9 + $0x8c] sm:$0xf0]  ;;  %v3269_v10 = vld [vmem:[%s4033_s9 + $0x48] sm:$0xf] }
 0x1ed   : > { %v1807_v17 = vadd.f32 %v1806_v19, %v1792_v48  ;;  %2146 = vmatpush.bf16.msrb.mxu2 %v3314_v39  ;;  %2195 = vmatpush.bf16.msrb.mxu3 %v3318_v32  ;;  %v3302_v38 = vor.u32 %v3524_v56, %v3301_v16  ;;  %v3294_v53 = vor.u32 %v3523_v5, %v3293_v1  ;;  %v3261_v39 = vld [vmem:[%s4033_s9 + $0x40] sm:$0xf]  ;;  %v3515_v25 = vld [vmem:[%s4033_s9 + $0x4c] sm:$0xf0]  ;;  %v3514_v32 = vld [vmem:[%s4033_s9 + $0x4c] sm:$0xf] }
 0x1ee   : > { %v1804_v48 = vmul.f32 %v4175_v47, %v4175_v47  ;;  %v3262_v57 = vor.u32 %v3515_v25, %v3261_v39  ;;  %v3274_v44 = vor.u32 %v3514_v32, %v3271_v27  ;;  %v3512_v16 = vld [vmem:[%s4033_s9 + $0x34] sm:$0xf0]  ;;  %v3510_v56 = vld [vmem:[%s4033_s9 + $0x2c] sm:$0xf]  ;;  %v3255_v1 = vld [vmem:[%s4033_s9 + $0x38] sm:$0xf0] }
 0x1ef   : > { %v1808_v28 = vadd.f32 %v1807_v17, %v1793_v35  ;;  %v3306_v35 = vor.u32 %v3522_v4, %v3303_v30  ;;  %2098 = vmatpush.bf16.msrb.mxu1 %v3294_v53  ;;  %v3517_v17 = vld [vmem:[%s4033_s9 + $0x64] sm:$0xf]  ;;  %v3258_v53 = vor.u32 %v3510_v56, %v3255_v1  ;;  %v3231_v30 = vld [vmem:[%s4033_s9 + $0x10] sm:$0xf0] }
 0x1f0   : > { %v3505_v4 = vld [vmem:[%s4033_s9 + $0x4] sm:$0xf] }
 0x1f1   : > { %v1809_v37 = vadd.f32 %v1808_v28, %v1794_v21  ;;  %2147 = vmatpush.bf16.msrb.mxu2 %v3298_v51  ;;  %2196 = vmatpush.bf16.msrb.mxu3 %v3302_v38  ;;  %v3279_v21 = vld [vmem:[%s4033_s9 + $0x70] sm:$0xf0]  ;;  %v3285_v28 = vld [vmem:[%s4033_s9 + $0x68] sm:$0xf]  ;;  %v3511_v51 = vld [vmem:[%s4033_s9 + $0x2c] sm:$0xf0] }
 0x1f2   : > { %2245 = vmatpush.bf16.msrb.mxu0 %v3306_v35  ;;  %v3234_v35 = vor.u32 %v3505_v4, %v3231_v30 }
 0x1f3   : > { %v1810_v13 = vadd.f32 %v1809_v37, %v1795_v49  ;;  %v3282_v37 = vor.u32 %v3517_v17, %v3279_v21  ;;  %v3508_v17 = vld [vmem:[%s4033_s9 + $0x14] sm:$0xf0]  ;;  %v3229_v21 = vld [vmem:[%s4033_s9] sm:$0xf] }
 0x1f5   : > { %v1811_v22 = vadd.f32 %v1810_v13, %v1796_v31  ;;  %v3520_v31 = vld [vmem:[%s4033_s9 + $0x74] sm:$0xf0]  ;;  %v3277_v13 = vld [vmem:[%s4033_s9 + $0x60] sm:$0xf]  ;;  %2148 = vmatpush.bf16.msrb.mxu2 %v3282_v37 }
 0x1f7   : > { %v1812_v29 = vadd.f32 %v1811_v22, %v1797_v2  ;;  %v3519_v2 = vld [vmem:[%s4033_s9 + $0x6c] sm:$0xf0]  ;;  %v3286_v22 = vor.u32 %v3520_v31, %v3285_v28  ;;  %v3506_v31 = vld [vmem:[%s4033_s9 + $0xc] sm:$0xf] }
 0x1f8   : > { %v3507_v28 = vld [vmem:[%s4033_s9 + $0xc] sm:$0xf0] }
 0x1f9   : > { %v1813_v20 = vadd.f32 %v1812_v29, %v1798_v43  ;;  %v3278_v43 = vor.u32 %v3519_v2, %v3277_v13  ;;  %v3518_v29 = vld [vmem:[%s4033_s9 + $0x6c] sm:$0xf]  ;;  %2197 = vmatpush.bf16.msrb.mxu3 %v3286_v22  ;;  %v3230_v37 = vor.u32 %v3507_v28, %v3229_v21  ;;  %v3239_v13 = vld [vmem:[%s4033_s9 + $0x18] sm:$0xf0] }
 0x1fa   : > { %v3242_v22 = vor.u32 %v3506_v31, %v3239_v13 }
 0x1fb   : > { %v1814_v34 = vadd.f32 %v1813_v20, %v1799_v42  ;;  %v3287_v42 = vld [vmem:[%s4033_s9 + $0x78] sm:$0xf0]  ;;  %2099 = vmatpush.bf16.msrb.mxu1 %v3278_v43 }
 0x1fd   : > { %v1815_v26 = vadd.f32 %v1814_v34, %v1800_v12  ;;  %v3290_v12 = vor.u32 %v3518_v29, %v3287_v42  ;;  %v3513_v34 = vld [vmem:[%s4033_s9 + $0x44] sm:$0xf] }
 0x1ff   : > { %v1816_v59 = vadd.f32 %v1815_v26, %v1801_v18  ;;  %2246 = vmatpush.bf16.msrb.mxu0 %v3290_v12  ;;  %v3266_v18 = vor.u32 %v3513_v34, %v3263_v7  ;;  %v3516_v26 = vld [vmem:[%s4033_s9 + $0x54] sm:$0xf0]  ;;  %2100 = vmatpush.bf16.msrb.mxu1 %v3262_v57  ;;  %v1827_v7 = vld [vmem:[%s270_s12] sm:$0x1] }
 0x200   : > { %v3270_v41 = vor.u32 %v3516_v26, %v3269_v10  ;;  %v4235_v26 = vld [vmem:[%s273_s30] ss:$0 sm:$0xff] }
 0x201   : > { %v1817_v24 = vadd.f32 %v1816_v59, %v1802_v58  ;;  %2149 = vmatpush.bf16.msrb.mxu2 %v3266_v18  ;;  %v3509_v58 = vld [vmem:[%s4033_s9 + $0x24] sm:$0xf]  ;;  %v3247_v59 = vld [vmem:[%s4033_s9 + $0x30] sm:$0xf0] }
 0x202   : > { %2198 = vmatpush.bf16.msrb.mxu3 %v3270_v41  ;;  %v3250_v52 = vor.u32 %v3509_v58, %v3247_v59 }
 0x203   : > { %v1818_v19 = vadd.f32 %v1817_v24, %v1803_v63  ;;  %2247 = vmatpush.bf16.msrb.mxu0 %v3274_v44  ;;  %v3245_v63 = vld [vmem:[%s4033_s9 + $0x20] sm:$0xf]  ;;  %v3254_v24 = vor.u32 %v3512_v16, %v3253_v60 }
 0x204   : > { %v3246_v38 = vor.u32 %v3511_v51, %v3245_v63 }
 0x205   : > { %v1819_v49 = vadd.f32 %v1818_v19, %v1804_v48  ;;  %2150 = vmatpush.bf16.msrb.mxu2 %v3250_v52  ;;  %v3237_v48 = vld [vmem:[%s4033_s9 + $0x8] sm:$0xf] }
 0x206   : > { %2199 = vmatpush.bf16.msrb.mxu3 %v3254_v24  ;;  %2101 = vmatpush.bf16.msrb.mxu1 %v3246_v38 }
 0x207   : > { %v1820_v20 = vrot.slane %v1819_v49, 4  ;;  %2248 = vmatpush.bf16.msrb.mxu0 %v3258_v53 }
 0x209   : > { %v1821_v23 = vadd.f32 %v1820_v20, %v1819_v49  ;;  %v3238_v49 = vor.u32 %v3508_v17, %v3237_v48  ;;  %2151 = vmatpush.bf16.msrb.mxu2 %v3234_v35 }
 0x20a   : > { %2102 = vmatpush.bf16.msrb.mxu1 %v3230_v37 }
 0x20b   : > { %v1822_v46 = vrot.slane %v1821_v23, 2  ;;  %2200 = vmatpush.bf16.msrb.mxu3 %v3238_v49  ;;  %2249 = vmatpush.bf16.msrb.mxu0 %v3242_v22 }
 0x20d   : > { %v1823_v54 = vadd.f32 %v1822_v46, %v1821_v23 }
 0x20f   : > { %v1824_v5 = vrot.slane %v1823_v54, 1 }
 0x211   : > { %v1825_v19 = vadd.f32 %v1824_v5, %v1823_v54 }
 0x213   : > { %v1826_v2 = vmul.f32 %v1825_v19, %v4094_v0 }
 0x215   : > { %v1828_v43 = vadd.f32 1e-05, %v1826_v2 }
 0x217   : > { %3584 = vrsqrt.f32 %v1828_v43  ;;  %vm1835_vm2 = vweird.f32 %v1828_v43 }
 0x21d   : > { %v3585_v29 = vpop.eup %3584 }
 0x21e   : > { %v1830_v42 = vmul.f32 %v3585_v29, %v1828_v43  ;;  %vm1836_vm1 = vweird.f32 %v3585_v29 }
 0x21f   : > { %vm1837_vm3 = vmor %vm1835_vm2, %vm1836_vm1 }
 0x220   : > { %v1831_v20 = vmul.f32 %v3585_v29, %v1830_v42 }
 0x222   : > { %v1832_v12 = vmul.f32 0.5, %v1831_v20 }
 0x224   : > { %v1833_v34 = vsub.f32 1.5, %v1832_v12 }
 0x226   : > { %v1834_v0 = vmul.f32 %v3585_v29, %v1833_v34 }
 0x228   : > { %v1838_v10 = vsel %vm1837_vm3, %v3585_v29, %v1834_v0 }
 0x229   : > { %v1839_v23 = vmul.f32 %v1838_v10, %v1827_v7 }
 0x22b   : > { %v4228_v18 = vperm.slane %v1839_v23, 0 }
 0x22d   : > { %v1858_v39 = vmul.f32 %v4228_v18, %v4175_v47  ;;  %v1843_v25 = vmul.f32 %v4228_v18, %v4098_v8  ;;  %v1844_v41 = vmul.f32 %v4228_v18, %v4101_v45  ;;  %v1851_v59 = vmul.f32 %v4228_v18, %v4122_v40 }
 0x22e   : > { %v1852_v47 = vmul.f32 %v4228_v18, %v4146_v55  ;;  %v1845_v8 = vmul.f32 %v4228_v18, %v4104_v15  ;;  %v1853_v45 = vmul.f32 %v4228_v18, %v4125_v62  ;;  %v1854_v52 = vmul.f32 %v4228_v18, %v4153_v14 }
 0x22f   : > { %v1878_v57 = vadd.f32 %v4235_v26, %v1858_v39  ;;  %v1863_v32 = vadd.f32 %v4235_v26, %v1843_v25  ;;  %v1864_v27 = vadd.f32 %v4235_v26, %v1844_v41  ;;  %v1871_v60 = vadd.f32 %v4235_v26, %v1851_v59 }
 0x230   : > { %v1872_v54 = vadd.f32 %v4235_v26, %v1852_v47  ;;  %v1873_v40 = vadd.f32 %v4235_v26, %v1853_v45  ;;  %v1855_v55 = vmul.f32 %v4228_v18, %v4127_v11  ;;  %v1856_v15 = vmul.f32 %v4228_v18, %v4160_v33 }
 0x231   : > { %v1879_v46 = vmax.f32 %v1863_v32, 0.0  ;;  %v1880_v44 = vmax.f32 %v1864_v27, 0.0  ;;  %v1846_v62 = vmul.f32 %v4228_v18, %v4107_v9  ;;  %v1887_v16 = vmax.f32 %v1871_v60, 0.0 }
 0x232   : > { %v1888_v63 = vmax.f32 %v1872_v54, 0.0  ;;  %v1874_v24 = vadd.f32 %v4235_v26, %v1854_v52  ;;  %v1889_v51 = vmax.f32 %v1873_v40, 0.0  ;;  %v1875_v14 = vadd.f32 %v4235_v26, %v1855_v55 }
 0x233   : > { %v1895_v58 = vpack.c.bf16 %v1880_v44, %v1879_v46  ;;  %v1876_v56 = vadd.f32 %v4235_v26, %v1856_v15  ;;  %v1857_v1 = vmul.f32 %v4228_v18, %v4129_v61  ;;  %v1894_v38 = vmax.f32 %v1878_v57, 0.0 }
 0x234   : > { %v1899_v5 = vpack.c.bf16 %v1888_v63, %v1887_v16  ;;  %v1890_v11 = vmax.f32 %v1874_v24, 0.0  ;;  %v1891_v53 = vmax.f32 %v1875_v14, 0.0  ;;  %v1865_v9 = vadd.f32 %v4235_v26, %v1845_v8 }
 0x235   : > { %2103 = vmatmul.bf16.vlgmr.msrb.gmra.mxu1 %v1895_v58  ;;  %2152 = vmatmul.bf16.vlgmr.msrb.gmra.mxu2 %v1895_v58  ;;  %v1892_v33 = vmax.f32 %v1876_v56, 0.0  ;;  %v1877_v4 = vadd.f32 %v4235_v26, %v1857_v1  ;;  %v1866_v30 = vadd.f32 %v4235_v26, %v1846_v62  ;;  %v1847_v61 = vmul.f32 %v4228_v18, %v4110_v6 }
 0x236   : > { %2201 = vmatmul.bf16.vlgmr.msrb.gmra.mxu3 %v1895_v58  ;;  %2250 = vmatmul.bf16.vlgmr.msrb.gmra.mxu0 %v1895_v58  ;;  %v1900_v48 = vpack.c.bf16 %v1890_v11, %v1889_v51  ;;  %v1881_v21 = vmax.f32 %v1865_v9, 0.0  ;;  %v1848_v37 = vmul.f32 %v4228_v18, %v4113_v3  ;;  %v1849_v29 = vmul.f32 %v4228_v18, %v4116_v50 }
 0x237   : > { %v1901_v19 = vpack.c.bf16 %v1892_v33, %v1891_v53  ;;  %v1893_v35 = vmax.f32 %v1877_v4, 0.0  ;;  %v1882_v28 = vmax.f32 %v1866_v30, 0.0  ;;  %v1867_v31 = vadd.f32 %v4235_v26, %v1847_v61 }
 0x238   : > { %v1868_v13 = vadd.f32 %v4235_v26, %v1848_v37  ;;  %v1850_v6 = vmul.f32 %v4228_v18, %v4119_v36  ;;  %v1869_v42 = vadd.f32 %v4235_v26, %v1849_v29 }
 0x239   : > { %v1902_v17 = vpack.c.bf16 %v1894_v38, %v1893_v35  ;;  %v1896_v49 = vpack.c.bf16 %v1882_v28, %v1881_v21  ;;  %v1883_v2 = vmax.f32 %v1867_v31, 0.0 }
 0x23a   : > { %v1884_v22 = vmax.f32 %v1868_v13, 0.0  ;;  %v1870_v3 = vadd.f32 %v4235_v26, %v1850_v6  ;;  %v1885_v20 = vmax.f32 %v1869_v42, 0.0 }
 0x23c   : > { %v1897_v43 = vpack.c.bf16 %v1884_v22, %v1883_v2  ;;  %v1886_v12 = vmax.f32 %v1870_v3, 0.0 }
 0x23e   : > { %v1898_v34 = vpack.c.bf16 %v1886_v12, %v1885_v20 }
 0x245   : > { %2108 = vmatmul.bf16.gmra.mxu1 %v1896_v49  ;;  %2157 = vmatmul.bf16.gmra.mxu2 %v1896_v49 }
 0x246   : > { %2206 = vmatmul.bf16.gmra.mxu3 %v1896_v49  ;;  %2255 = vmatmul.bf16.gmra.mxu0 %v1896_v49 }
 0x255   : > { %2113 = vmatmul.bf16.gmra.mxu1 %v1897_v43  ;;  %2162 = vmatmul.bf16.gmra.mxu2 %v1897_v43 }
 0x256   : > { %2211 = vmatmul.bf16.gmra.mxu3 %v1897_v43  ;;  %2260 = vmatmul.bf16.gmra.mxu0 %v1897_v43 }
 0x265   : > { %2118 = vmatmul.bf16.gmra.mxu1 %v1898_v34  ;;  %2167 = vmatmul.bf16.gmra.mxu2 %v1898_v34 }
 0x266   : > { %2216 = vmatmul.bf16.gmra.mxu3 %v1898_v34  ;;  %2265 = vmatmul.bf16.gmra.mxu0 %v1898_v34 }
 0x275   : > { %2123 = vmatmul.bf16.gmra.mxu1 %v1899_v5  ;;  %2172 = vmatmul.bf16.gmra.mxu2 %v1899_v5 }
 0x276   : > { %2221 = vmatmul.bf16.gmra.mxu3 %v1899_v5  ;;  %2270 = vmatmul.bf16.gmra.mxu0 %v1899_v5 }
 0x285   : > { %2128 = vmatmul.bf16.gmra.mxu1 %v1900_v48  ;;  %2177 = vmatmul.bf16.gmra.mxu2 %v1900_v48 }
 0x286   : > { %2226 = vmatmul.bf16.gmra.mxu3 %v1900_v48  ;;  %2275 = vmatmul.bf16.gmra.mxu0 %v1900_v48 }
 0x295   : > { %2133 = vmatmul.bf16.gmra.mxu1 %v1901_v19  ;;  %2182 = vmatmul.bf16.gmra.mxu2 %v1901_v19 }
 0x296   : > { %2231 = vmatmul.bf16.gmra.mxu3 %v1901_v19  ;;  %2280 = vmatmul.bf16.gmra.mxu0 %v1901_v19 }
 0x2a5   : > { %2138 = vmatmul.bf16.gmra.mxu1 %v1902_v17  ;;  %2187 = vmatmul.bf16.gmra.mxu2 %v1902_v17 }
 0x2a6   : > { %2236 = vmatmul.bf16.gmra.mxu3 %v1902_v17  ;;  %2285 = vmatmul.bf16.gmra.mxu0 %v1902_v17 }
 0x2b2   : > { %v4285_v50 = vpop.f32.mrf.mxu1 }
 0x2b3   : > { %v4287_v36 = vpop.f32.mrf.mxu0 }
 0x2b8   : > { %v4289_v7 = vpop.f32.mrf.mxu2 }
 0x2b9   : > { %v4291_v0 = vpop.f32.mrf.mxu3 }
 0x2ba   : > { %v4293_v10 = vpop.f32.mrf.mxu1 }
 0x2bb   : > { %v4295_v23 = vpop.f32.mrf.mxu0 }
 0x2c0   : > { %v4297_v18 = vpop.f32.mrf.mxu2 }
 0x2c1   : > { %v4299_v26 = vpop.f32.mrf.mxu3 }
 0x2c2   : > { %v4301_v39 = vpop.f32.mrf.mxu1 }
 0x2c3   : > { %v4303_v25 = vpop.f32.mrf.mxu0 }
 0x2c8   : > { %v4305_v41 = vpop.f32.mrf.mxu2 }
 0x2c9   : > { %v4307_v57 = vpop.f32.mrf.mxu3 }
 0x2ca   : > { %v4309_v32 = vpop.f32.mrf.mxu1 }
 0x2cb   : > { %v4311_v27 = vpop.f32.mrf.mxu0 }
 0x2d0   : > { %v4313_v46 = vpop.f32.mrf.mxu2 }
 0x2d1   : > { %v4315_v44 = vpop.f32.mrf.mxu3 }
 0x2d2   : > { %v4317_v58 = vpop.f32.mrf.mxu1 }
 0x2d3   : > { %v4319_v59 = vpop.f32.mrf.mxu0 }
 0x2d8   : > { %v4321_v47 = vpop.f32.mrf.mxu2 }
 0x2d9   : > { %v4323_v8 = vpop.f32.mrf.mxu3 }
 0x2da   : > { %v4325_v45 = vpop.f32.mrf.mxu1 }
 0x2db   : > { %v4327_v60 = vpop.f32.mrf.mxu0 }
 0x2e0   : > { %v4329_v54 = vpop.f32.mrf.mxu2 }
 0x2e1   : > { %v4331_v52 = vpop.f32.mrf.mxu3 }
 0x2e2   : > { %v4333_v40 = vpop.f32.mrf.mxu1 }
 0x2e3   : > { %v4335_v55 = vpop.f32.mrf.mxu0 }
 0x2e8   : > { %v4337_v15 = vpop.f32.mrf.mxu2 }
 0x2e9   : > { %v4339_v62 = vpop.f32.mrf.mxu3 }
 0x2ea   : > { %v4341_v16 = vpop.f32.mrf.mxu1 }
 0x2eb   : > { %v4343_v63 = vpop.f32.mrf.mxu0 }
 0x2f0   : > { %v4345_v24 = vpop.f32.mrf.mxu2 }
 0x2f1   : > { %v4347_v51 = vpop.f32.mrf.mxu3 }
 0x2f2   : > { %v4349_v14 = vpop.f32.mrf.mxu1 }
 0x2f3   : > { %v4351_v56 = vpop.f32.mrf.mxu0 }
 0x2f8   : > { %v4353_v1 = vpop.f32.mrf.mxu2 }
 0x2f9   : > { %v4355_v5 = vpop.f32.mrf.mxu3 }
 0x2fa   : > { %v4357_v11 = vpop.f32.mrf.mxu1 }
 0x2fb   : > { %v4359_v38 = vpop.f32.mrf.mxu0 }
 0x300   : > { %v4361_v53 = vpop.f32.mrf.mxu2 }
 0x301   : > { %v4363_v33 = vpop.f32.mrf.mxu3 }
 0x302   : > { %v4365_v4 = vpop.f32.mrf.mxu1 }
 0x303   : > { %v4367_v9 = vpop.f32.mrf.mxu0 }
 0x308   : > { %v4369_v30 = vpop.f32.mrf.mxu2 }
 0x309   : > { %v4371_v48 = vpop.f32.mrf.mxu3 }
 0x30a   : > { %v4373_v19 = vpop.f32.mrf.mxu1 }
 0x30b   : > { %v4375_v35 = vpop.f32.mrf.mxu0 }
 0x310   : > { %v4377_v17 = vpop.f32.mrf.mxu2 }
 0x311   : > { %v4379_v21 = vpop.f32.mrf.mxu3 }
 0x312   : > { %v4381_v28 = vpop.f32.mrf.mxu1 }
 0x313   : > { %v4383_v49 = vpop.f32.mrf.mxu0 }
 0x314   : > { %4555 = vst [vmem:[#allocation5_spill] sm:$0xff] %v4383_v49 }
 0x318   : > { %v4385_v61 = vpop.f32.mrf.mxu2 }
 0x319   : > { %4556 = vst [vmem:[#allocation6_spill] sm:$0xff] %v4385_v61  ;;  %v4387_v37 = vpop.f32.mrf.mxu3 }
 0x31a   : > { %4557 = vst [vmem:[#allocation7_spill] sm:$0xff] %v4387_v37  ;;  %v4389_v31 = vpop.f32.mrf.mxu1 }
 0x31b   : > { %4558 = vst [vmem:[#allocation8_spill] sm:$0xff] %v4389_v31  ;;  %v4391_v13 = vpop.f32.mrf.mxu0 }
 0x31c   : > { %4559 = vst [vmem:[#allocation9_spill] sm:$0xff] %v4391_v13 }
 0x320   : > { %v4393_v2 = vpop.f32.mrf.mxu2 }
 0x321   : > { %4560 = vst [vmem:[#allocation10_spill] sm:$0xff] %v4393_v2  ;;  %v4395_v22 = vpop.f32.mrf.mxu3 }
 0x322   : > { %4561 = vst [vmem:[#allocation11_spill] sm:$0xff] %v4395_v22  ;;  %v4397_v43 = vpop.f32.mrf.mxu1 }
 0x323   : > { %4562 = vst [vmem:[#allocation12_spill] sm:$0xff] %v4397_v43  ;;  %v4399_v29 = vpop.f32.mrf.mxu0 }
 0x324   : > { %4563 = vst [vmem:[#allocation13_spill] sm:$0xff] %v4399_v29 }
 0x328   : > { %v4401_v6 = vpop.f32.mrf.mxu2 }
 0x329   : > { %4564 = vst [vmem:[#allocation14_spill] sm:$0xff] %v4401_v6  ;;  %v4403_v42 = vpop.f32.mrf.mxu3 }
 0x32a   : > { %4565 = vst [vmem:[#allocation15_spill] sm:$0xff] %v4403_v42  ;;  %v4405_v3 = vpop.f32.mrf.mxu1 }
 0x32b   : > { %4566 = vst [vmem:[#allocation16_spill] sm:$0xff] %v4405_v3  ;;  %v4407_v20 = vpop.f32.mrf.mxu0 }
 0x32c   : > { %4567 = vst [vmem:[#allocation17_spill] sm:$0xff] %v4407_v20 }
 0x32e   : > { %2294 = sbr.rel (%p3355_p4) target bundleno = 884 (0x374), region = 44 }
 0x330   : > { %v4409_v12 = vpop.f32.mrf.mxu2 }
 0x331   : > { %4568 = vst [vmem:[#allocation18_spill] sm:$0xff] %v4409_v12  ;;  %v4411_v34 = vpop.f32.mrf.mxu3 }
 0x332   : > { %4569 = vst [vmem:[#allocation19_spill] sm:$0xff] %v4411_v34 }
 0x333   : > { %v3627_v13 = vmov 0.0  }
 0x334   : > { %2295 = vst [vmem:[#allocation2] sm:$0xff] %v3627_v13 }
 0x335   : > { %2296 = vst [vmem:[#allocation2 + $0x8] sm:$0xff] %v3627_v13 }
 0x336   : > { %2297 = vst [vmem:[#allocation2 + $0x10] sm:$0xff] %v3627_v13 }
 0x337   : > { %2298 = vst [vmem:[#allocation2 + $0x18] sm:$0xff] %v3627_v13 }
 0x338   : > { %2299 = vst [vmem:[#allocation2 + $0x20] sm:$0xff] %v3627_v13 }
 0x339   : > { %2300 = vst [vmem:[#allocation2 + $0x28] sm:$0xff] %v3627_v13 }
 0x33a   : > { %2301 = vst [vmem:[#allocation2 + $0x30] sm:$0xff] %v3627_v13 }
 0x33b   : > { %2302 = vst [vmem:[#allocation2 + $0x38] sm:$0xff] %v3627_v13 }
 0x33c   : > { %2303 = vst [vmem:[#allocation2 + $0x40] sm:$0xff] %v3627_v13 }
 0x33d   : > { %2304 = vst [vmem:[#allocation2 + $0x48] sm:$0xff] %v3627_v13 }
 0x33e   : > { %2305 = vst [vmem:[#allocation2 + $0x50] sm:$0xff] %v3627_v13 }
 0x33f   : > { %2306 = vst [vmem:[#allocation2 + $0x58] sm:$0xff] %v3627_v13 }
 0x340   : > { %2307 = vst [vmem:[#allocation2 + $0x60] sm:$0xff] %v3627_v13 }
 0x341   : > { %2308 = vst [vmem:[#allocation2 + $0x68] sm:$0xff] %v3627_v13 }
 0x342   : > { %2309 = vst [vmem:[#allocation2 + $0x70] sm:$0xff] %v3627_v13 }
 0x343   : > { %2310 = vst [vmem:[#allocation2 + $0x78] sm:$0xff] %v3627_v13 }
 0x344   : > { %2311 = vst [vmem:[#allocation2 + $0x80] sm:$0xff] %v3627_v13 }
 0x345   : > { %2312 = vst [vmem:[#allocation2 + $0x88] sm:$0xff] %v3627_v13 }
 0x346   : > { %2313 = vst [vmem:[#allocation2 + $0x90] sm:$0xff] %v3627_v13 }
 0x347   : > { %2314 = vst [vmem:[#allocation2 + $0x98] sm:$0xff] %v3627_v13 }
 0x348   : > { %2315 = vst [vmem:[#allocation2 + $0xa0] sm:$0xff] %v3627_v13 }
 0x349   : > { %2316 = vst [vmem:[#allocation2 + $0xa8] sm:$0xff] %v3627_v13 }
 0x34a   : > { %2317 = vst [vmem:[#allocation2 + $0xb0] sm:$0xff] %v3627_v13 }
 0x34b   : > { %2318 = vst [vmem:[#allocation2 + $0xb8] sm:$0xff] %v3627_v13 }
 0x34c   : > { %2319 = vst [vmem:[#allocation2 + $0xc0] sm:$0xff] %v3627_v13 }
 0x34d   : > { %2320 = vst [vmem:[#allocation2 + $0xc8] sm:$0xff] %v3627_v13 }
 0x34e   : > { %2321 = vst [vmem:[#allocation2 + $0xd0] sm:$0xff] %v3627_v13 }
 0x34f   : > { %2322 = vst [vmem:[#allocation2 + $0xd8] sm:$0xff] %v3627_v13 }
 0x350   : > { %2323 = vst [vmem:[#allocation2 + $0xe0] sm:$0xff] %v3627_v13 }
 0x351   : > { %2324 = vst [vmem:[#allocation2 + $0xe8] sm:$0xff] %v3627_v13 }
 0x352   : > { %2325 = vst [vmem:[#allocation2 + $0xf0] sm:$0xff] %v3627_v13 }
 0x353   : > { %2326 = vst [vmem:[#allocation2 + $0xf8] sm:$0xff] %v3627_v13 }
 0x354   : > { %2327 = vst [vmem:[#allocation2 + $0x100] sm:$0xff] %v3627_v13 }
 0x355   : > { %2328 = vst [vmem:[#allocation2 + $0x108] sm:$0xff] %v3627_v13 }
 0x356   : > { %2329 = vst [vmem:[#allocation2 + $0x110] sm:$0xff] %v3627_v13 }
 0x357   : > { %2330 = vst [vmem:[#allocation2 + $0x118] sm:$0xff] %v3627_v13 }
 0x358   : > { %2331 = vst [vmem:[#allocation2 + $0x120] sm:$0xff] %v3627_v13 }
 0x359   : > { %2332 = vst [vmem:[#allocation2 + $0x128] sm:$0xff] %v3627_v13 }
 0x35a   : > { %2333 = vst [vmem:[#allocation2 + $0x130] sm:$0xff] %v3627_v13 }
 0x35b   : > { %2334 = vst [vmem:[#allocation2 + $0x138] sm:$0xff] %v3627_v13 }
 0x35c   : > { %2335 = vst [vmem:[#allocation2 + $0x140] sm:$0xff] %v3627_v13 }
 0x35d   : > { %2336 = vst [vmem:[#allocation2 + $0x148] sm:$0xff] %v3627_v13 }
 0x35e   : > { %2337 = vst [vmem:[#allocation2 + $0x150] sm:$0xff] %v3627_v13 }
 0x35f   : > { %2338 = vst [vmem:[#allocation2 + $0x158] sm:$0xff] %v3627_v13 }
 0x360   : > { %2339 = vst [vmem:[#allocation2 + $0x160] sm:$0xff] %v3627_v13 }
 0x361   : > { %2340 = vst [vmem:[#allocation2 + $0x168] sm:$0xff] %v3627_v13 }
 0x362   : > { %2341 = vst [vmem:[#allocation2 + $0x170] sm:$0xff] %v3627_v13 }
 0x363   : > { %2342 = vst [vmem:[#allocation2 + $0x178] sm:$0xff] %v3627_v13 }
 0x364   : > { %2343 = vst [vmem:[#allocation2 + $0x180] sm:$0xff] %v3627_v13 }
 0x365   : > { %2344 = vst [vmem:[#allocation2 + $0x188] sm:$0xff] %v3627_v13 }
 0x366   : > { %2345 = vst [vmem:[#allocation2 + $0x190] sm:$0xff] %v3627_v13 }
 0x367   : > { %2346 = vst [vmem:[#allocation2 + $0x198] sm:$0xff] %v3627_v13 }
 0x368   : > { %2347 = vst [vmem:[#allocation2 + $0x1a0] sm:$0xff] %v3627_v13 }
 0x369   : > { %2348 = vst [vmem:[#allocation2 + $0x1a8] sm:$0xff] %v3627_v13 }
 0x36a   : > { %2349 = vst [vmem:[#allocation2 + $0x1b0] sm:$0xff] %v3627_v13 }
 0x36b   : > { %2350 = vst [vmem:[#allocation2 + $0x1b8] sm:$0xff] %v3627_v13 }
 0x36c   : > { %2351 = vst [vmem:[#allocation2 + $0x1c0] sm:$0xff] %v3627_v13 }
 0x36d   : > { %2352 = vst [vmem:[#allocation2 + $0x1c8] sm:$0xff] %v3627_v13 }
 0x36e   : > { %2353 = vst [vmem:[#allocation2 + $0x1d0] sm:$0xff] %v3627_v13 }
 0x36f   : > { %2354 = vst [vmem:[#allocation2 + $0x1d8] sm:$0xff] %v3627_v13 }
 0x370   : > { %2355 = vst [vmem:[#allocation2 + $0x1e0] sm:$0xff] %v3627_v13 }
 0x371   : > { %2356 = vst [vmem:[#allocation2 + $0x1e8] sm:$0xff] %v3627_v13 }
 0x372   : > { %2357 = vst [vmem:[#allocation2 + $0x1f0] sm:$0xff] %v3627_v13 }
 0x373   : > { %2358 = vst [vmem:[#allocation2 + $0x1f8] sm:$0xff] %v3627_v13 }
 0x374 PF: > { %v2359_v20 = vld [vmem:[#allocation2] sm:$0xff]  ;;  %v2360_v34 = vld [vmem:[#allocation2 + $0x8] sm:$0xff]  ;;  %v2361_v12 = vld [vmem:[#allocation2 + $0x10] sm:$0xff]  ;;  %s3628_s15 = smov [#allocation2]   ;;  %s2558_s21 = sshll.u32 %s4554_s5, 4  ;;  %s2559_s21 = int_to_ptr.hbm [resolvable:$true] %s2558_s21 }
 0x375   : > { %v2423_v3 = vadd.f32 %v2359_v20, %v4285_v50  ;;  %v2424_v29 = vadd.f32 %v2360_v34, %v4289_v7  ;;  %v2425_v42 = vadd.f32 %v2361_v12, %v4291_v0  ;;  %v2362_v6 = vld [vmem:[#allocation2 + $0x18] sm:$0xff]  ;;  %v2363_v43 = vld [vmem:[#allocation2 + $0x20] sm:$0xff]  ;;  %v2364_v22 = vld [vmem:[#allocation2 + $0x28] sm:$0xff]  ;;  %s2556_s16 = sshll.u32 %s3628_s15, 4  ;;  %p3566_p5 = scmp.eq.s32.totalorder %s3667_s19, 3  ;;  %s2557_s16 = int_to_ptr.vmem [resolvable:$true] %s2556_s16 }
 0x376   : > { %v2426_v2 = vadd.f32 %v2362_v6, %v4287_v36  ;;  %v2365_v31 = vld [vmem:[#allocation2 + $0x30] sm:$0xff]  ;;  %v2427_v49 = vadd.f32 %v2363_v43, %v4293_v10  ;;  %v2366_v13 = vld [vmem:[#allocation2 + $0x38] sm:$0xff]  ;;  %v2428_v37 = vadd.f32 %v2364_v22, %v4297_v18  ;;  %v2367_v61 = vld [vmem:[#allocation2 + $0x40] sm:$0xff]  ;;  %s3629_s22 = smov 512   ;;  %s3630_s23 = smov 32  }
 0x377   : > { %2487 = vst [vmem:[#allocation2] sm:$0xff] %v2423_v3  ;;  %v2429_v50 = vadd.f32 %v2365_v31, %v4299_v26  ;;  %v2368_v7 = vld [vmem:[#allocation2 + $0x48] sm:$0xff]  ;;  %v2430_v0 = vadd.f32 %v2366_v13, %v4295_v23  ;;  %v2369_v20 = vld [vmem:[#allocation2 + $0x50] sm:$0xff]  ;;  %v2431_v36 = vadd.f32 %v2367_v61, %v4301_v39  ;;  %v2370_v6 = vld [vmem:[#allocation2 + $0x58] sm:$0xff] }
 0x378   : > { %2488 = vst [vmem:[#allocation2 + $0x8] sm:$0xff] %v2424_v29  ;;  %v2432_v10 = vadd.f32 %v2368_v7, %v4305_v41  ;;  %v2371_v43 = vld [vmem:[#allocation2 + $0x60] sm:$0xff]  ;;  %v2433_v18 = vadd.f32 %v2369_v20, %v4307_v57  ;;  %v2372_v22 = vld [vmem:[#allocation2 + $0x68] sm:$0xff]  ;;  %v2434_v26 = vadd.f32 %v2370_v6, %v4303_v25  ;;  %v2373_v31 = vld [vmem:[#allocation2 + $0x70] sm:$0xff] }
 0x379   : > { %2489 = vst [vmem:[#allocation2 + $0x10] sm:$0xff] %v2425_v42  ;;  %v2435_v23 = vadd.f32 %v2371_v43, %v4309_v32  ;;  %v2436_v39 = vadd.f32 %v2372_v22, %v4313_v46  ;;  %v2437_v41 = vadd.f32 %v2373_v31, %v4315_v44  ;;  %v2376_v61 = vld [vmem:[#allocation2 + $0x88] sm:$0xff]  ;;  %v2378_v29 = vld [vmem:[#allocation2 + $0x98] sm:$0xff]  ;;  %v2379_v42 = vld [vmem:[#allocation2 + $0xa0] sm:$0xff] }
 0x37a   : > { %2490 = vst [vmem:[#allocation2 + $0x18] sm:$0xff] %v2426_v2  ;;  %v2374_v2 = vld [vmem:[#allocation2 + $0x78] sm:$0xff]  ;;  %v2440_v32 = vadd.f32 %v2376_v61, %v4321_v47  ;;  %v2380_v3 = vld [vmem:[#allocation2 + $0xa8] sm:$0xff]  ;;  %v2442_v44 = vadd.f32 %v2378_v29, %v4319_v59  ;;  %v2381_v12 = vld [vmem:[#allocation2 + $0xb0] sm:$0xff] }
 0x37b   : > { %2491 = vst [vmem:[#allocation2 + $0x20] sm:$0xff] %v2427_v49  ;;  %v2375_v49 = vld [vmem:[#allocation2 + $0x80] sm:$0xff]  ;;  %v2438_v57 = vadd.f32 %v2374_v2, %v4311_v27  ;;  %v2443_v27 = vadd.f32 %v2379_v42, %v4325_v45  ;;  %v2382_v34 = vld [vmem:[#allocation2 + $0xb8] sm:$0xff]  ;;  %v2445_v47 = vadd.f32 %v2381_v12, %v4331_v52  ;;  %v2385_v7 = vld [vmem:[#allocation2 + $0xd0] sm:$0xff] }
 0x37c   : > { %2492 = vst [vmem:[#allocation2 + $0x28] sm:$0xff] %v2428_v37  ;;  %v2377_v37 = vld [vmem:[#allocation2 + $0x90] sm:$0xff]  ;;  %v2439_v25 = vadd.f32 %v2375_v49, %v4317_v58  ;;  %v2444_v58 = vadd.f32 %v2380_v3, %v4329_v54  ;;  %v2383_v13 = vld [vmem:[#allocation2 + $0xc0] sm:$0xff]  ;;  %v2449_v54 = vadd.f32 %v2385_v7, %v4339_v62  ;;  %v4570_v12 = vld [vmem:[#allocation6_spill] sm:$0xff] }
 0x37d   : > { %2493 = vst [vmem:[#allocation2 + $0x30] sm:$0xff] %v2429_v50  ;;  %v2441_v46 = vadd.f32 %v2377_v37, %v4323_v8  ;;  %v2384_v50 = vld [vmem:[#allocation2 + $0xc8] sm:$0xff]  ;;  %v2446_v8 = vadd.f32 %v2382_v34, %v4327_v60  ;;  %v2447_v59 = vadd.f32 %v2383_v13, %v4333_v40  ;;  %v2387_v20 = vld [vmem:[#allocation2 + $0xe0] sm:$0xff]  ;;  %v2389_v6 = vld [vmem:[#allocation2 + $0xf0] sm:$0xff] }
 0x37e   : > { %2494 = vst [vmem:[#allocation2 + $0x38] sm:$0xff] %v2430_v0  ;;  %v2386_v0 = vld [vmem:[#allocation2 + $0xd8] sm:$0xff]  ;;  %v2448_v45 = vadd.f32 %v2384_v50, %v4337_v15  ;;  %v2451_v60 = vadd.f32 %v2387_v20, %v4341_v16  ;;  %v2391_v43 = vld [vmem:[#allocation2 + $0x100] sm:$0xff]  ;;  %v2453_v15 = vadd.f32 %v2389_v6, %v4347_v51  ;;  %v2393_v22 = vld [vmem:[#allocation2 + $0x110] sm:$0xff] }
 0x37f   : > { %2495 = vst [vmem:[#allocation2 + $0x40] sm:$0xff] %v2431_v36  ;;  %v2388_v36 = vld [vmem:[#allocation2 + $0xe8] sm:$0xff]  ;;  %v2450_v52 = vadd.f32 %v2386_v0, %v4335_v55  ;;  %v2455_v55 = vadd.f32 %v2391_v43, %v4349_v14  ;;  %v2395_v31 = vld [vmem:[#allocation2 + $0x120] sm:$0xff]  ;;  %v2397_v2 = vld [vmem:[#allocation2 + $0x130] sm:$0xff] }
 0x380   : > { %2496 = vst [vmem:[#allocation2 + $0x48] sm:$0xff] %v2432_v10  ;;  %v2390_v10 = vld [vmem:[#allocation2 + $0xf8] sm:$0xff]  ;;  %v2452_v40 = vadd.f32 %v2388_v36, %v4345_v24  ;;  %v2457_v24 = vadd.f32 %v2393_v22, %v4355_v5  ;;  %v2399_v49 = vld [vmem:[#allocation2 + $0x140] sm:$0xff]  ;;  %v2401_v61 = vld [vmem:[#allocation2 + $0x150] sm:$0xff] }
 0x381   : > { %2497 = vst [vmem:[#allocation2 + $0x50] sm:$0xff] %v2433_v18  ;;  %v2392_v18 = vld [vmem:[#allocation2 + $0x108] sm:$0xff]  ;;  %v2454_v62 = vadd.f32 %v2390_v10, %v4343_v63  ;;  %v2459_v63 = vadd.f32 %v2395_v31, %v4357_v11  ;;  %v2403_v37 = vld [vmem:[#allocation2 + $0x160] sm:$0xff]  ;;  %v2405_v29 = vld [vmem:[#allocation2 + $0x170] sm:$0xff] }
 0x382   : > { %2498 = vst [vmem:[#allocation2 + $0x58] sm:$0xff] %v2434_v26  ;;  %v2394_v26 = vld [vmem:[#allocation2 + $0x118] sm:$0xff]  ;;  %v2456_v16 = vadd.f32 %v2392_v18, %v4353_v1  ;;  %v2461_v1 = vadd.f32 %v2397_v2, %v4363_v33  ;;  %v2407_v42 = vld [vmem:[#allocation2 + $0x180] sm:$0xff]  ;;  %v2409_v3 = vld [vmem:[#allocation2 + $0x190] sm:$0xff] }
 0x383   : > { %2499 = vst [vmem:[#allocation2 + $0x60] sm:$0xff] %v2435_v23  ;;  %v2396_v23 = vld [vmem:[#allocation2 + $0x128] sm:$0xff]  ;;  %v2458_v51 = vadd.f32 %v2394_v26, %v4351_v56  ;;  %v2463_v56 = vadd.f32 %v2399_v49, %v4365_v4  ;;  %v4571_v34 = vld [vmem:[#allocation7_spill] sm:$0xff]  ;;  %v4572_v13 = vld [vmem:[#allocation5_spill] sm:$0xff] }
 0x384   : > { %2500 = vst [vmem:[#allocation2 + $0x68] sm:$0xff] %v2436_v39  ;;  %v2398_v39 = vld [vmem:[#allocation2 + $0x138] sm:$0xff]  ;;  %v2460_v14 = vadd.f32 %v2396_v23, %v4361_v53  ;;  %v2465_v53 = vadd.f32 %v2401_v61, %v4371_v48  ;;  %v4574_v7 = vld [vmem:[#allocation10_spill] sm:$0xff]  ;;  %v4575_v0 = vld [vmem:[#allocation11_spill] sm:$0xff] }
 0x385   : > { %2501 = vst [vmem:[#allocation2 + $0x70] sm:$0xff] %v2437_v41  ;;  %v2400_v41 = vld [vmem:[#allocation2 + $0x148] sm:$0xff]  ;;  %v2462_v5 = vadd.f32 %v2398_v39, %v4359_v38  ;;  %v2467_v38 = vadd.f32 %v2403_v37, %v4373_v19  ;;  %v4573_v50 = vld [vmem:[#allocation8_spill] sm:$0xff]  ;;  %v4579_v18 = vld [vmem:[#allocation15_spill] sm:$0xff] }
 0x386   : > { %2502 = vst [vmem:[#allocation2 + $0x78] sm:$0xff] %v2438_v57  ;;  %v2402_v57 = vld [vmem:[#allocation2 + $0x158] sm:$0xff]  ;;  %v2464_v11 = vadd.f32 %v2400_v41, %v4369_v30  ;;  %v2469_v30 = vadd.f32 %v2405_v29, %v4379_v21  ;;  %v2416_v20 = vld [vmem:[#allocation2 + $0x1c8] sm:$0xff] }
 0x387   : > { %2503 = vst [vmem:[#allocation2 + $0x80] sm:$0xff] %v2439_v25  ;;  %v2404_v25 = vld [vmem:[#allocation2 + $0x168] sm:$0xff]  ;;  %v2466_v33 = vadd.f32 %v2402_v57, %v4367_v9  ;;  %v2471_v9 = vadd.f32 %v2407_v42, %v4381_v28  ;;  %v4577_v6 = vld [vmem:[#allocation12_spill] sm:$0xff] }
 0x388   : > { %2504 = vst [vmem:[#allocation2 + $0x88] sm:$0xff] %v2440_v32  ;;  %v2406_v32 = vld [vmem:[#allocation2 + $0x178] sm:$0xff]  ;;  %v2468_v4 = vadd.f32 %v2404_v25, %v4377_v17  ;;  %v2473_v17 = vadd.f32 %v2409_v3, %v4571_v34  ;;  %v2420_v22 = vld [vmem:[#allocation2 + $0x1e8] sm:$0xff] }
 0x389   : > { %2505 = vst [vmem:[#allocation2 + $0x90] sm:$0xff] %v2441_v46  ;;  %v2408_v46 = vld [vmem:[#allocation2 + $0x188] sm:$0xff]  ;;  %v2470_v48 = vadd.f32 %v2406_v32, %v4375_v35  ;;  %v2418_v10 = vld [vmem:[#allocation2 + $0x1d8] sm:$0xff] }
 0x38a   : > { %2506 = vst [vmem:[#allocation2 + $0x98] sm:$0xff] %v2442_v44  ;;  %v2410_v44 = vld [vmem:[#allocation2 + $0x198] sm:$0xff]  ;;  %v2472_v19 = vadd.f32 %v2408_v46, %v4570_v12 }
 0x38b   : > { %2507 = vst [vmem:[#allocation2 + $0xa0] sm:$0xff] %v2443_v27  ;;  %v2411_v27 = vld [vmem:[#allocation2 + $0x1a0] sm:$0xff]  ;;  %v2474_v21 = vadd.f32 %v2410_v44, %v4572_v13  ;;  %v4581_v31 = vld [vmem:[#allocation16_spill] sm:$0xff] }
 0x38c   : > { %2508 = vst [vmem:[#allocation2 + $0xa8] sm:$0xff] %v2444_v58  ;;  %v2412_v58 = vld [vmem:[#allocation2 + $0x1a8] sm:$0xff]  ;;  %v2475_v35 = vadd.f32 %v2411_v27, %v4573_v50  ;;  %v2422_v23 = vld [vmem:[#allocation2 + $0x1f8] sm:$0xff] }
 0x38d   : > { %2509 = vst [vmem:[#allocation2 + $0xb0] sm:$0xff] %v2445_v47  ;;  %v2413_v47 = vld [vmem:[#allocation2 + $0x1b0] sm:$0xff]  ;;  %v2476_v28 = vadd.f32 %v2412_v58, %v4574_v7 }
 0x38e   : > { %2510 = vst [vmem:[#allocation2 + $0xb8] sm:$0xff] %v2446_v8  ;;  %v2414_v8 = vld [vmem:[#allocation2 + $0x1b8] sm:$0xff] }
 0x38f   : > { %2511 = vst [vmem:[#allocation2 + $0xc0] sm:$0xff] %v2447_v59  ;;  %v2415_v59 = vld [vmem:[#allocation2 + $0x1c0] sm:$0xff] }
 0x390   : > { %2512 = vst [vmem:[#allocation2 + $0xc8] sm:$0xff] %v2448_v45  ;;  %v2477_v45 = vadd.f32 %v2413_v47, %v4575_v0 }
 0x391   : > { %2513 = vst [vmem:[#allocation2 + $0xd0] sm:$0xff] %v2449_v54  ;;  %v4576_v54 = vld [vmem:[#allocation9_spill] sm:$0xff] }
 0x392   : > { %2514 = vst [vmem:[#allocation2 + $0xd8] sm:$0xff] %v2450_v52  ;;  %v2478_v36 = vadd.f32 %v2414_v8, %v4576_v54  ;;  %v2417_v52 = vld [vmem:[#allocation2 + $0x1d0] sm:$0xff] }
 0x393   : > { %2515 = vst [vmem:[#allocation2 + $0xe0] sm:$0xff] %v2451_v60  ;;  %v2479_v60 = vadd.f32 %v2415_v59, %v4577_v6 }
 0x394   : > { %2516 = vst [vmem:[#allocation2 + $0xe8] sm:$0xff] %v2452_v40  ;;  %v4578_v40 = vld [vmem:[#allocation14_spill] sm:$0xff] }
 0x395   : > { %2517 = vst [vmem:[#allocation2 + $0xf0] sm:$0xff] %v2453_v15  ;;  %v2480_v43 = vadd.f32 %v2416_v20, %v4578_v40  ;;  %v2419_v15 = vld [vmem:[#allocation2 + $0x1e0] sm:$0xff] }
 0x396   : > { %2518 = vst [vmem:[#allocation2 + $0xf8] sm:$0xff] %v2454_v62  ;;  %v2481_v62 = vadd.f32 %v2417_v52, %v4579_v18 }
 0x397   : > { %2519 = vst [vmem:[#allocation2 + $0x100] sm:$0xff] %v2455_v55  ;;  %v4580_v55 = vld [vmem:[#allocation13_spill] sm:$0xff] }
 0x398   : > { %2520 = vst [vmem:[#allocation2 + $0x108] sm:$0xff] %v2456_v16  ;;  %v2482_v26 = vadd.f32 %v2418_v10, %v4580_v55  ;;  %v2421_v16 = vld [vmem:[#allocation2 + $0x1f0] sm:$0xff] }
 0x399   : > { %2521 = vst [vmem:[#allocation2 + $0x110] sm:$0xff] %v2457_v24  ;;  %v2483_v24 = vadd.f32 %v2419_v15, %v4581_v31 }
 0x39a   : > { %2522 = vst [vmem:[#allocation2 + $0x118] sm:$0xff] %v2458_v51  ;;  %v4582_v51 = vld [vmem:[#allocation18_spill] sm:$0xff] }
 0x39b   : > { %2523 = vst [vmem:[#allocation2 + $0x120] sm:$0xff] %v2459_v63  ;;  %v2484_v2 = vadd.f32 %v2420_v22, %v4582_v51  ;;  %v4583_v63 = vld [vmem:[#allocation19_spill] sm:$0xff] }
 0x39c   : > { %2524 = vst [vmem:[#allocation2 + $0x128] sm:$0xff] %v2460_v14  ;;  %v2485_v39 = vadd.f32 %v2421_v16, %v4583_v63  ;;  %v4584_v14 = vld [vmem:[#allocation17_spill] sm:$0xff] }
 0x39d   : > { %2525 = vst [vmem:[#allocation2 + $0x130] sm:$0xff] %v2461_v1  ;;  %v2486_v49 = vadd.f32 %v2422_v23, %v4584_v14 }
 0x39e   : > { %2526 = vst [vmem:[#allocation2 + $0x138] sm:$0xff] %v2462_v5 }
 0x39f   : > { %2527 = vst [vmem:[#allocation2 + $0x140] sm:$0xff] %v2463_v56 }
 0x3a0   : > { %2528 = vst [vmem:[#allocation2 + $0x148] sm:$0xff] %v2464_v11 }
 0x3a1   : > { %2529 = vst [vmem:[#allocation2 + $0x150] sm:$0xff] %v2465_v53 }
 0x3a2   : > { %2530 = vst [vmem:[#allocation2 + $0x158] sm:$0xff] %v2466_v33 }
 0x3a3   : > { %2531 = vst [vmem:[#allocation2 + $0x160] sm:$0xff] %v2467_v38 }
 0x3a4   : > { %2532 = vst [vmem:[#allocation2 + $0x168] sm:$0xff] %v2468_v4 }
 0x3a5   : > { %2533 = vst [vmem:[#allocation2 + $0x170] sm:$0xff] %v2469_v30 }
 0x3a6   : > { %2534 = vst [vmem:[#allocation2 + $0x178] sm:$0xff] %v2470_v48 }
 0x3a7   : > { %2535 = vst [vmem:[#allocation2 + $0x180] sm:$0xff] %v2471_v9 }
 0x3a8   : > { %2536 = vst [vmem:[#allocation2 + $0x188] sm:$0xff] %v2472_v19 }
 0x3a9   : > { %2537 = vst [vmem:[#allocation2 + $0x190] sm:$0xff] %v2473_v17 }
 0x3aa   : > { %2538 = vst [vmem:[#allocation2 + $0x198] sm:$0xff] %v2474_v21 }
 0x3ab   : > { %2539 = vst [vmem:[#allocation2 + $0x1a0] sm:$0xff] %v2475_v35 }
 0x3ac   : > { %2540 = vst [vmem:[#allocation2 + $0x1a8] sm:$0xff] %v2476_v28 }
 0x3ad   : > { %2541 = vst [vmem:[#allocation2 + $0x1b0] sm:$0xff] %v2477_v45 }
 0x3ae   : > { %2542 = vst [vmem:[#allocation2 + $0x1b8] sm:$0xff] %v2478_v36 }
 0x3af   : > { %2543 = vst [vmem:[#allocation2 + $0x1c0] sm:$0xff] %v2479_v60 }
 0x3b0   : > { %2544 = vst [vmem:[#allocation2 + $0x1c8] sm:$0xff] %v2480_v43 }
 0x3b1   : > { %2545 = vst [vmem:[#allocation2 + $0x1d0] sm:$0xff] %v2481_v62 }
 0x3b2   : > { %2546 = vst [vmem:[#allocation2 + $0x1d8] sm:$0xff] %v2482_v26 }
 0x3b3   : > { %2547 = vst [vmem:[#allocation2 + $0x1e0] sm:$0xff] %v2483_v24 }
 0x3b4   : > { %2548 = vst [vmem:[#allocation2 + $0x1e8] sm:$0xff] %v2484_v2 }
 0x3b5   : > { %2549 = vst [vmem:[#allocation2 + $0x1f0] sm:$0xff] %v2485_v39 }
 0x3b6   : > { %2550 = vst [vmem:[#allocation2 + $0x1f8] sm:$0xff] %v2486_v49 }
 0x3b7   : > { %3563 = dma.vmem_to_hbm [thread:$0]  (%p3566_p5), %s2557_s16, 8192, %s2559_s21, [#allocation3], %s3629_s22, %s3629_s22, %s3630_s23  }
 0x3b8   : > { %3619 = dma.done.wait (%p3566_p5), [#allocation3], 8192  }
 0x3b9   : > { %3621 = vsyncadd (%p3566_p5), [#allocation3], 4294959104 }
 0x3ba PF: > { %s16_s18 = sadd.s32 1, %s3624_s18  }
 0x3bb   : > { %p13_p6 = scmp.ge.s32.totalorder %s16_s18, 6  }
 0x3bd   :  { %15 = sbr.rel (!%p13_p6) target bundleno = 1 (0x1), region = 83 }
 0x3c2   :  { %2575 = vsyncpa [#allocation3], 1 }
 0x3c3   :  { %2577 = vsyncpa [#allocation3 + $0x1], 1 }

</bundles_post_ra>
